<compile_context>
chip_gen: v5e
topology: v5e:2x2
jax: 0.10.0
libtpu: 0.0.40
codegen_flags: <defaults>
</compile_context>

<pallas_src>
import jax
import jax.numpy as jnp
from jax.experimental import pallas as pl
from jax.experimental.pallas import tpu as pltpu


def _make_kernel(cin, cmid, cout, kernsz, length, lane_w, sub):
    pad_l = (kernsz - 1) // 2  # nn.Conv1d 'same': extra pad goes on the right for even K
    shifts = [j - pad_l for j in range(kernsz)]

    def kernel(x_ref, win_ref, wout_ref, o_ref):
        # x_ref   : (1, Cin, sub, lane_w)   VMEM  (batches packed on sublanes + lanes)
        # win_ref : (Cmid*Cin*K,)           SMEM  conv_in taps with w_mid folded in
        # wout_ref: (Cout*Cmid*K,)          SMEM  conv_out taps
        # o_ref   : (1, Cout, sub, lane_w)  VMEM

        # Local position inside each length-L batch segment along the lane
        # axis; built once and reused for every shift mask (hoisted).
        pos = jax.lax.broadcasted_iota(jnp.int32, (sub, lane_w), 1) % length
        masks = {d: (pos + d >= 0) & (pos + d < length)
                 for d in set(shifts) if d != 0}

        def seg_shift(a, d):
            # a[..., q] -> a[..., q + d] inside each length-L segment, zeros
            # outside ('same' zero padding).  The roll runs on the XLU; any
            # wrap across segment / array boundaries is killed by the mask.
            if d == 0:
                return a
            rolled = pltpu.roll(a, (-d) % lane_w, axis=1)
            return jnp.where(masks[d], rolled, jnp.zeros_like(rolled))

        # Pre-shifted per-input-channel slabs, reused for every middle channel.
        # Kept in the input dtype (bf16 inputs stay bf16 here, halving slab
        # footprint on v6e/v7x); all accumulation below is f32.
        xsh = [[seg_shift(x_ref[0, c], d) for d in shifts] for c in range(cin)]

        acc = [jnp.zeros((sub, lane_w), jnp.float32) for _ in range(cout)]

        # Tiny (low-rank) channel counts -> skip the MXU: every tap is a
        # scalar(SMEM)-broadcast FMA on the VPU, accumulated in f32.
        # TODO(synk): for large ch_middle / long L, drive both stages as
        # im2col matmuls on the (idle) MXU instead.
        for m in range(cmid):
            # ---- conv_in (fast per-channel scale already folded into taps) ----
            mid = jnp.zeros((sub, lane_w), jnp.float32)
            for c in range(cin):
                base = (m * cin + c) * kernsz
                for j in range(kernsz):
                    mid = mid + win_ref[base + j] * xsh[c][j]
            # ---- conv_out: 'same' zero-clipped shifts of the length-L mid ----
            for j, d in enumerate(shifts):
                mid_d = seg_shift(mid, d)
                for o in range(cout):
                    acc[o] = acc[o] + wout_ref[(o * cmid + m) * kernsz + j] * mid_d

        # Direct per-channel stores (no concatenate / extra output copy).
        for o in range(cout):
            o_ref[0, o] = acc[o].astype(o_ref.dtype)

    return kernel


def _choose_packing(n, length):
    """Pick (row, sub): batches per sublane row (lane axis) and sublane rows per
    block.  Targets ~512-wide lane slabs and up to 8 sublane rows, shrinks for
    small batch counts, and exposes >=2 'parallel' grid steps when possible."""
    row = max(1, 512 // length)              # ~512 lanes per sublane row
    row_min = max(1, -(-128 // length))      # keep each row lane-dense (>=128)
    sub = 8
    # Bound zero-padding waste: shrink while half the block still holds all N.
    while sub > 1 and (sub // 2) * row >= n:
        sub //= 2
    while row > row_min and (row // 2) * sub >= n:
        row //= 2
    # v7x megacore: give the 'parallel' grid axis >= 2 steps when there are
    # enough batches to keep every step's lane axis fully packed.
    if n > row and -(-n // (row * sub)) < 2 and sub > 1:
        sub = max(1, -(-n // (2 * row)))
    return row, sub


@jax.jit
def fast_params_conv1d(x, w_in, w_mid, w_out):
    """x: (N, C_in, L); w_in: (C_mid, C_in, K); w_mid: (C_mid, 1); w_out: (C_out, C_mid, K)."""
    n, cin, length = x.shape
    cmid, _, kernsz = w_in.shape
    cout = w_out.shape[0]

    # Fold the fast per-channel scale into conv_in's taps (exact: the scale
    # commutes with the length-L clipping between the two convs).
    w_in_folded = (w_in.astype(jnp.float32)
                   * w_mid.astype(jnp.float32)[:, :, None]).reshape(-1)
    w_out_flat = w_out.astype(jnp.float32).reshape(-1)

    # Batch packing: `row` batches side by side along lanes (each a contiguous
    # length-L segment), `sub` such rows along sublanes, per grid step.
    row, sub = _choose_packing(n, length)
    lane_w = row * length
    bpb = row * sub                    # batches per grid step
    g = -(-n // bpb)
    n_pad = g * bpb

    # Layout plumbing (cheap XLA reshape/transpose): (N, Cin, L) ->
    # (G, Cin, sub, row*L) so the kernel sees lane-dense 2-D slabs.
    xp = jnp.pad(x, ((0, n_pad - n), (0, 0), (0, 0)))
    xp = xp.reshape(g, sub, row, cin, length)
    xp = xp.transpose(0, 3, 1, 2, 4).reshape(g, cin, sub, lane_w)

    kernel = _make_kernel(cin, cmid, cout, kernsz, length, lane_w, sub)

    # TODO(synk): for very long L (>> 512), add an L-tile grid axis with a
    # (K-1) halo instead of packing batches along lanes.
    yp = pl.pallas_call(
        kernel,
        out_shape=jax.ShapeDtypeStruct((g, cout, sub, lane_w), x.dtype),
        grid=(g,),
        in_specs=[
            pl.BlockSpec((1, cin, sub, lane_w), lambda b: (b, 0, 0, 0)),
            pl.BlockSpec(memory_space=pltpu.MemorySpace.SMEM),
            pl.BlockSpec(memory_space=pltpu.MemorySpace.SMEM),
        ],
        out_specs=pl.BlockSpec((1, cout, sub, lane_w), lambda b: (b, 0, 0, 0)),
        compiler_params=pltpu.CompilerParams(
            dimension_semantics=("parallel",),
            # Blocks are at most a few hundred KiB (double-buffered); this
            # explicit limit also fits v7x's 64 MiB-physical VMEM.
            vmem_limit_bytes=32 * 1024 * 1024,
        ),
    )(xp, w_in_folded, w_out_flat)

    # Undo the packing and drop the zero-padded batches.
    y = yp.reshape(g, cout, sub, row, length)
    y = y.transpose(0, 2, 3, 1, 4).reshape(n_pad, cout, length)
    return y[:n]


def _reference(x, w_in, w_mid, w_out):
    """Pure-JAX reference (cross-correlation + asymmetric 'same' pad, like nn.Conv1d)."""
    k = w_in.shape[-1]
    pad = [((k - 1) // 2, (k - 1) - (k - 1) // 2)]
    dn = ('NCH', 'OIH', 'NCH')
    mid = jax.lax.conv_general_dilated(x, w_in, (1,), pad, dimension_numbers=dn)
    mid = mid * w_mid[None]                                    # (1, Cmid, 1) broadcast
    return jax.lax.conv_general_dilated(mid, w_out, (1,), pad, dimension_numbers=dn)


if __name__ == "__main__":
    # Small shapes consistent with the module: Conv1d inputs are (N, C, L).
    N, ch_in, ch_middle, ch_out, L, kernsz = 2, 4, 8, 4, 16, 3

    key = jax.random.PRNGKey(0)
    kx, k1, k2, k3 = jax.random.split(key, 4)
    x = jax.random.normal(kx, (N, ch_in, L), dtype=jnp.float32)
    # Deterministic "torch.randn"-style parameter init (shapes match __init__).
    w_in = jax.random.normal(k1, (ch_middle, ch_in, kernsz), dtype=jnp.float32)
    w_mid = jax.random.normal(k2, (ch_middle, 1), dtype=jnp.float32)
    w_out = jax.random.normal(k3, (ch_out, ch_middle, kernsz), dtype=jnp.float32)

    y = fast_params_conv1d(x, w_in, w_mid, w_out)
    jax.block_until_ready(y)

    y_ref = _reference(x, w_in, w_mid, w_out)
    assert y.shape == (N, ch_out, L)
    assert jnp.allclose(y, y_ref, atol=1e-4, rtol=1e-4), "mismatch vs reference"

    print("KERNEL_OK")
</pallas_src>

<mosaic_0001>
module attributes {stable_mosaic.version = 11 : i64} {
  func.func @kernel(%arg0: i32, %arg1: memref<1x4x1x128xf32, #tpu.memory_space<vmem>>, %arg2: memref<96xf32, #tpu.memory_space<smem>>, %arg3: memref<96xf32, #tpu.memory_space<smem>>, %arg4: memref<1x4x1x128xf32, #tpu.memory_space<vmem>>) attributes {dimension_semantics = [#tpu.dimension_semantics<parallel>], iteration_bounds = array<i64: 1>, scalar_prefetch = 0 : i64, scratch_operands = 0 : i64, tpu.core_type = #tpu.core_type<tc>, window_params = [{transform_indices = @transform_0, window_bounds = array<i64: 1, 4, 1, 128>}, {transform_indices = @transform_1, window_bounds = array<i64: 96>}, {transform_indices = @transform_2, window_bounds = array<i64: 96>}, {transform_indices = @transform_3, window_bounds = array<i64: 1, 4, 1, 128>}]} {
    %0 = tpu.iota {dimensions = array<i32: 1>} : vector<1x128xi32>
    %c16_i32 = arith.constant 16 : i32
    %c0_i32 = arith.constant 0 : i32
    %1 = arith.cmpi eq, %c16_i32, %c0_i32 : i32
    %c1_i32 = arith.constant 1 : i32
    %2 = arith.select %1, %c1_i32, %c16_i32 : i32
    %3 = vector.broadcast %2 : i32 to vector<1x128xi32>
    %4 = arith.remsi %0, %3 : vector<1x128xi32>
    %c0_i32_0 = arith.constant 0 : i32
    %5 = vector.broadcast %c0_i32_0 : i32 to vector<1x128xi32>
    %6 = arith.cmpi ne, %4, %5 : vector<1x128xi32>
    %c0_i32_1 = arith.constant 0 : i32
    %7 = vector.broadcast %c0_i32_1 : i32 to vector<1x128xi32>
    %8 = arith.cmpi slt, %4, %7 : vector<1x128xi32>
    %c0_i32_2 = arith.constant 0 : i32
    %9 = arith.cmpi slt, %2, %c0_i32_2 : i32
    %10 = vector.broadcast %9 : i1 to vector<1x128xi1>
    %11 = vector.broadcast %10 : vector<1x128xi1> to vector<1x128xi1>
    %12 = arith.xori %8, %11 : vector<1x128xi1>
    %13 = arith.andi %12, %6 : vector<1x128xi1>
    %14 = vector.broadcast %2 : i32 to vector<1x128xi32>
    %15 = arith.addi %4, %14 : vector<1x128xi32>
    %16 = arith.select %13, %15, %4 : vector<1x128xi1>, vector<1x128xi32>
    %c1_i32_3 = arith.constant 1 : i32
    %17 = vector.broadcast %c1_i32_3 : i32 to vector<1x128xi32>
    %18 = arith.addi %16, %17 : vector<1x128xi32>
    %c0_i32_4 = arith.constant 0 : i32
    %19 = vector.broadcast %c0_i32_4 : i32 to vector<1x128xi32>
    %20 = arith.cmpi sge, %18, %19 : vector<1x128xi32>
    %c1_i32_5 = arith.constant 1 : i32
    %21 = vector.broadcast %c1_i32_5 : i32 to vector<1x128xi32>
    %22 = arith.addi %16, %21 : vector<1x128xi32>
    %c16_i32_6 = arith.constant 16 : i32
    %23 = vector.broadcast %c16_i32_6 : i32 to vector<1x128xi32>
    %24 = arith.cmpi slt, %22, %23 : vector<1x128xi32>
    %25 = arith.andi %20, %24 : vector<1x128xi1>
    %c-1_i32 = arith.constant -1 : i32
    %26 = vector.broadcast %c-1_i32 : i32 to vector<1x128xi32>
    %27 = arith.addi %16, %26 : vector<1x128xi32>
    %c0_i32_7 = arith.constant 0 : i32
    %28 = vector.broadcast %c0_i32_7 : i32 to vector<1x128xi32>
    %29 = arith.cmpi sge, %27, %28 : vector<1x128xi32>
    %c-1_i32_8 = arith.constant -1 : i32
    %30 = vector.broadcast %c-1_i32_8 : i32 to vector<1x128xi32>
    %31 = arith.addi %16, %30 : vector<1x128xi32>
    %c16_i32_9 = arith.constant 16 : i32
    %32 = vector.broadcast %c16_i32_9 : i32 to vector<1x128xi32>
    %33 = arith.cmpi slt, %31, %32 : vector<1x128xi32>
    %34 = arith.andi %29, %33 : vector<1x128xi1>
    %c0 = arith.constant 0 : index
    %c0_10 = arith.constant 0 : index
    %c0_11 = arith.constant 0 : index
    %c0_12 = arith.constant 0 : index
    %35 = vector.load %arg1[%c0, %c0_10, %c0_11, %c0_12] : memref<1x4x1x128xf32, #tpu.memory_space<vmem>>, vector<1x1x1x128xf32>
    %36 = vector.shape_cast %35 : vector<1x1x1x128xf32> to vector<1x128xf32>
    %c1_i32_13 = arith.constant 1 : i32
    %37 = tpu.dynamic_rotate %36 by %c1_i32_13 dim 1 : vector<1x128xf32>, i32 -> vector<1x128xf32>
    %cst = arith.constant 0.000000e+00 : f32
    %38 = vector.broadcast %cst : f32 to vector<1x128xf32>
    %39 = arith.select %34, %37, %38 : vector<1x128xi1>, vector<1x128xf32>
    %c0_14 = arith.constant 0 : index
    %c0_15 = arith.constant 0 : index
    %c0_16 = arith.constant 0 : index
    %c0_17 = arith.constant 0 : index
    %40 = vector.load %arg1[%c0_14, %c0_15, %c0_16, %c0_17] : memref<1x4x1x128xf32, #tpu.memory_space<vmem>>, vector<1x1x1x128xf32>
    %41 = vector.shape_cast %40 : vector<1x1x1x128xf32> to vector<1x128xf32>
    %c0_18 = arith.constant 0 : index
    %c0_19 = arith.constant 0 : index
    %c0_20 = arith.constant 0 : index
    %c0_21 = arith.constant 0 : index
    %42 = vector.load %arg1[%c0_18, %c0_19, %c0_20, %c0_21] : memref<1x4x1x128xf32, #tpu.memory_space<vmem>>, vector<1x1x1x128xf32>
    %43 = vector.shape_cast %42 : vector<1x1x1x128xf32> to vector<1x128xf32>
    %c127_i32 = arith.constant 127 : i32
    %44 = tpu.dynamic_rotate %43 by %c127_i32 dim 1 : vector<1x128xf32>, i32 -> vector<1x128xf32>
    %cst_22 = arith.constant 0.000000e+00 : f32
    %45 = vector.broadcast %cst_22 : f32 to vector<1x128xf32>
    %46 = arith.select %25, %44, %45 : vector<1x128xi1>, vector<1x128xf32>
    %c0_23 = arith.constant 0 : index
    %c1 = arith.constant 1 : index
    %c0_24 = arith.constant 0 : index
    %c0_25 = arith.constant 0 : index
    %47 = vector.load %arg1[%c0_23, %c1, %c0_24, %c0_25] : memref<1x4x1x128xf32, #tpu.memory_space<vmem>>, vector<1x1x1x128xf32>
    %48 = vector.shape_cast %47 : vector<1x1x1x128xf32> to vector<1x128xf32>
    %c1_i32_26 = arith.constant 1 : i32
    %49 = tpu.dynamic_rotate %48 by %c1_i32_26 dim 1 : vector<1x128xf32>, i32 -> vector<1x128xf32>
    %cst_27 = arith.constant 0.000000e+00 : f32
    %50 = vector.broadcast %cst_27 : f32 to vector<1x128xf32>
    %51 = arith.select %34, %49, %50 : vector<1x128xi1>, vector<1x128xf32>
    %c0_28 = arith.constant 0 : index
    %c1_29 = arith.constant 1 : index
    %c0_30 = arith.constant 0 : index
    %c0_31 = arith.constant 0 : index
    %52 = vector.load %arg1[%c0_28, %c1_29, %c0_30, %c0_31] : memref<1x4x1x128xf32, #tpu.memory_space<vmem>>, vector<1x1x1x128xf32>
    %53 = vector.shape_cast %52 : vector<1x1x1x128xf32> to vector<1x128xf32>
    %c0_32 = arith.constant 0 : index
    %c1_33 = arith.constant 1 : index
    %c0_34 = arith.constant 0 : index
    %c0_35 = arith.constant 0 : index
    %54 = vector.load %arg1[%c0_32, %c1_33, %c0_34, %c0_35] : memref<1x4x1x128xf32, #tpu.memory_space<vmem>>, vector<1x1x1x128xf32>
    %55 = vector.shape_cast %54 : vector<1x1x1x128xf32> to vector<1x128xf32>
    %c127_i32_36 = arith.constant 127 : i32
    %56 = tpu.dynamic_rotate %55 by %c127_i32_36 dim 1 : vector<1x128xf32>, i32 -> vector<1x128xf32>
    %cst_37 = arith.constant 0.000000e+00 : f32
    %57 = vector.broadcast %cst_37 : f32 to vector<1x128xf32>
    %58 = arith.select %25, %56, %57 : vector<1x128xi1>, vector<1x128xf32>
    %c0_38 = arith.constant 0 : index
    %c2 = arith.constant 2 : index
    %c0_39 = arith.constant 0 : index
    %c0_40 = arith.constant 0 : index
    %59 = vector.load %arg1[%c0_38, %c2, %c0_39, %c0_40] : memref<1x4x1x128xf32, #tpu.memory_space<vmem>>, vector<1x1x1x128xf32>
    %60 = vector.shape_cast %59 : vector<1x1x1x128xf32> to vector<1x128xf32>
    %c1_i32_41 = arith.constant 1 : i32
    %61 = tpu.dynamic_rotate %60 by %c1_i32_41 dim 1 : vector<1x128xf32>, i32 -> vector<1x128xf32>
    %cst_42 = arith.constant 0.000000e+00 : f32
    %62 = vector.broadcast %cst_42 : f32 to vector<1x128xf32>
    %63 = arith.select %34, %61, %62 : vector<1x128xi1>, vector<1x128xf32>
    %c0_43 = arith.constant 0 : index
    %c2_44 = arith.constant 2 : index
    %c0_45 = arith.constant 0 : index
    %c0_46 = arith.constant 0 : index
    %64 = vector.load %arg1[%c0_43, %c2_44, %c0_45, %c0_46] : memref<1x4x1x128xf32, #tpu.memory_space<vmem>>, vector<1x1x1x128xf32>
    %65 = vector.shape_cast %64 : vector<1x1x1x128xf32> to vector<1x128xf32>
    %c0_47 = arith.constant 0 : index
    %c2_48 = arith.constant 2 : index
    %c0_49 = arith.constant 0 : index
    %c0_50 = arith.constant 0 : index
    %66 = vector.load %arg1[%c0_47, %c2_48, %c0_49, %c0_50] : memref<1x4x1x128xf32, #tpu.memory_space<vmem>>, vector<1x1x1x128xf32>
    %67 = vector.shape_cast %66 : vector<1x1x1x128xf32> to vector<1x128xf32>
    %c127_i32_51 = arith.constant 127 : i32
    %68 = tpu.dynamic_rotate %67 by %c127_i32_51 dim 1 : vector<1x128xf32>, i32 -> vector<1x128xf32>
    %cst_52 = arith.constant 0.000000e+00 : f32
    %69 = vector.broadcast %cst_52 : f32 to vector<1x128xf32>
    %70 = arith.select %25, %68, %69 : vector<1x128xi1>, vector<1x128xf32>
    %c0_53 = arith.constant 0 : index
    %c3 = arith.constant 3 : index
    %c0_54 = arith.constant 0 : index
    %c0_55 = arith.constant 0 : index
    %71 = vector.load %arg1[%c0_53, %c3, %c0_54, %c0_55] : memref<1x4x1x128xf32, #tpu.memory_space<vmem>>, vector<1x1x1x128xf32>
    %72 = vector.shape_cast %71 : vector<1x1x1x128xf32> to vector<1x128xf32>
    %c1_i32_56 = arith.constant 1 : i32
    %73 = tpu.dynamic_rotate %72 by %c1_i32_56 dim 1 : vector<1x128xf32>, i32 -> vector<1x128xf32>
    %cst_57 = arith.constant 0.000000e+00 : f32
    %74 = vector.broadcast %cst_57 : f32 to vector<1x128xf32>
    %75 = arith.select %34, %73, %74 : vector<1x128xi1>, vector<1x128xf32>
    %c0_58 = arith.constant 0 : index
    %c3_59 = arith.constant 3 : index
    %c0_60 = arith.constant 0 : index
    %c0_61 = arith.constant 0 : index
    %76 = vector.load %arg1[%c0_58, %c3_59, %c0_60, %c0_61] : memref<1x4x1x128xf32, #tpu.memory_space<vmem>>, vector<1x1x1x128xf32>
    %77 = vector.shape_cast %76 : vector<1x1x1x128xf32> to vector<1x128xf32>
    %c0_62 = arith.constant 0 : index
    %c3_63 = arith.constant 3 : index
    %c0_64 = arith.constant 0 : index
    %c0_65 = arith.constant 0 : index
    %78 = vector.load %arg1[%c0_62, %c3_63, %c0_64, %c0_65] : memref<1x4x1x128xf32, #tpu.memory_space<vmem>>, vector<1x1x1x128xf32>
    %79 = vector.shape_cast %78 : vector<1x1x1x128xf32> to vector<1x128xf32>
    %c127_i32_66 = arith.constant 127 : i32
    %80 = tpu.dynamic_rotate %79 by %c127_i32_66 dim 1 : vector<1x128xf32>, i32 -> vector<1x128xf32>
    %cst_67 = arith.constant 0.000000e+00 : f32
    %81 = vector.broadcast %cst_67 : f32 to vector<1x128xf32>
    %82 = arith.select %25, %80, %81 : vector<1x128xi1>, vector<1x128xf32>
    %cst_68 = arith.constant 0.000000e+00 : f32
    %83 = vector.broadcast %cst_68 : f32 to vector<1x128xf32>
    %cst_69 = arith.constant 0.000000e+00 : f32
    %84 = vector.broadcast %cst_69 : f32 to vector<1x128xf32>
    %cst_70 = arith.constant 0.000000e+00 : f32
    %85 = vector.broadcast %cst_70 : f32 to vector<1x128xf32>
    %cst_71 = arith.constant 0.000000e+00 : f32
    %86 = vector.broadcast %cst_71 : f32 to vector<1x128xf32>
    %cst_72 = arith.constant 0.000000e+00 : f32
    %87 = vector.broadcast %cst_72 : f32 to vector<1x128xf32>
    %c0_73 = arith.constant 0 : index
    %88 = memref.load %arg2[%c0_73] : memref<96xf32, #tpu.memory_space<smem>>
    %89 = vector.broadcast %88 : f32 to vector<1x128xf32>
    %90 = arith.mulf %89, %39 : vector<1x128xf32>
    %91 = arith.addf %87, %90 : vector<1x128xf32>
    %c1_74 = arith.constant 1 : index
    %92 = memref.load %arg2[%c1_74] : memref<96xf32, #tpu.memory_space<smem>>
    %93 = vector.broadcast %92 : f32 to vector<1x128xf32>
    %94 = arith.mulf %93, %41 : vector<1x128xf32>
    %95 = arith.addf %91, %94 : vector<1x128xf32>
    %c2_75 = arith.constant 2 : index
    %96 = memref.load %arg2[%c2_75] : memref<96xf32, #tpu.memory_space<smem>>
    %97 = vector.broadcast %96 : f32 to vector<1x128xf32>
    %98 = arith.mulf %97, %46 : vector<1x128xf32>
    %99 = arith.addf %95, %98 : vector<1x128xf32>
    %c3_76 = arith.constant 3 : index
    %100 = memref.load %arg2[%c3_76] : memref<96xf32, #tpu.memory_space<smem>>
    %101 = vector.broadcast %100 : f32 to vector<1x128xf32>
    %102 = arith.mulf %101, %51 : vector<1x128xf32>
    %103 = arith.addf %99, %102 : vector<1x128xf32>
    %c4 = arith.constant 4 : index
    %104 = memref.load %arg2[%c4] : memref<96xf32, #tpu.memory_space<smem>>
    %105 = vector.broadcast %104 : f32 to vector<1x128xf32>
    %106 = arith.mulf %105, %53 : vector<1x128xf32>
    %107 = arith.addf %103, %106 : vector<1x128xf32>
    %c5 = arith.constant 5 : index
    %108 = memref.load %arg2[%c5] : memref<96xf32, #tpu.memory_space<smem>>
    %109 = vector.broadcast %108 : f32 to vector<1x128xf32>
    %110 = arith.mulf %109, %58 : vector<1x128xf32>
    %111 = arith.addf %107, %110 : vector<1x128xf32>
    %c6 = arith.constant 6 : index
    %112 = memref.load %arg2[%c6] : memref<96xf32, #tpu.memory_space<smem>>
    %113 = vector.broadcast %112 : f32 to vector<1x128xf32>
    %114 = arith.mulf %113, %63 : vector<1x128xf32>
    %115 = arith.addf %111, %114 : vector<1x128xf32>
    %c7 = arith.constant 7 : index
    %116 = memref.load %arg2[%c7] : memref<96xf32, #tpu.memory_space<smem>>
    %117 = vector.broadcast %116 : f32 to vector<1x128xf32>
    %118 = arith.mulf %117, %65 : vector<1x128xf32>
    %119 = arith.addf %115, %118 : vector<1x128xf32>
    %c8 = arith.constant 8 : index
    %120 = memref.load %arg2[%c8] : memref<96xf32, #tpu.memory_space<smem>>
    %121 = vector.broadcast %120 : f32 to vector<1x128xf32>
    %122 = arith.mulf %121, %70 : vector<1x128xf32>
    %123 = arith.addf %119, %122 : vector<1x128xf32>
    %c9 = arith.constant 9 : index
    %124 = memref.load %arg2[%c9] : memref<96xf32, #tpu.memory_space<smem>>
    %125 = vector.broadcast %124 : f32 to vector<1x128xf32>
    %126 = arith.mulf %125, %75 : vector<1x128xf32>
    %127 = arith.addf %123, %126 : vector<1x128xf32>
    %c10 = arith.constant 10 : index
    %128 = memref.load %arg2[%c10] : memref<96xf32, #tpu.memory_space<smem>>
    %129 = vector.broadcast %128 : f32 to vector<1x128xf32>
    %130 = arith.mulf %129, %77 : vector<1x128xf32>
    %131 = arith.addf %127, %130 : vector<1x128xf32>
    %c11 = arith.constant 11 : index
    %132 = memref.load %arg2[%c11] : memref<96xf32, #tpu.memory_space<smem>>
    %133 = vector.broadcast %132 : f32 to vector<1x128xf32>
    %134 = arith.mulf %133, %82 : vector<1x128xf32>
    %135 = arith.addf %131, %134 : vector<1x128xf32>
    %c1_i32_77 = arith.constant 1 : i32
    %136 = tpu.dynamic_rotate %135 by %c1_i32_77 dim 1 : vector<1x128xf32>, i32 -> vector<1x128xf32>
    %cst_78 = arith.constant 0.000000e+00 : f32
    %137 = vector.broadcast %cst_78 : f32 to vector<1x128xf32>
    %138 = arith.select %34, %136, %137 : vector<1x128xi1>, vector<1x128xf32>
    %c0_79 = arith.constant 0 : index
    %139 = memref.load %arg3[%c0_79] : memref<96xf32, #tpu.memory_space<smem>>
    %140 = vector.broadcast %139 : f32 to vector<1x128xf32>
    %141 = arith.mulf %140, %138 : vector<1x128xf32>
    %142 = arith.addf %83, %141 : vector<1x128xf32>
    %c24 = arith.constant 24 : index
    %143 = memref.load %arg3[%c24] : memref<96xf32, #tpu.memory_space<smem>>
    %144 = vector.broadcast %143 : f32 to vector<1x128xf32>
    %145 = arith.mulf %144, %138 : vector<1x128xf32>
    %146 = arith.addf %84, %145 : vector<1x128xf32>
    %c48 = arith.constant 48 : index
    %147 = memref.load %arg3[%c48] : memref<96xf32, #tpu.memory_space<smem>>
    %148 = vector.broadcast %147 : f32 to vector<1x128xf32>
    %149 = arith.mulf %148, %138 : vector<1x128xf32>
    %150 = arith.addf %85, %149 : vector<1x128xf32>
    %c72 = arith.constant 72 : index
    %151 = memref.load %arg3[%c72] : memref<96xf32, #tpu.memory_space<smem>>
    %152 = vector.broadcast %151 : f32 to vector<1x128xf32>
    %153 = arith.mulf %152, %138 : vector<1x128xf32>
    %154 = arith.addf %86, %153 : vector<1x128xf32>
    %c1_80 = arith.constant 1 : index
    %155 = memref.load %arg3[%c1_80] : memref<96xf32, #tpu.memory_space<smem>>
    %156 = vector.broadcast %155 : f32 to vector<1x128xf32>
    %157 = arith.mulf %156, %135 : vector<1x128xf32>
    %158 = arith.addf %142, %157 : vector<1x128xf32>
    %c25 = arith.constant 25 : index
    %159 = memref.load %arg3[%c25] : memref<96xf32, #tpu.memory_space<smem>>
    %160 = vector.broadcast %159 : f32 to vector<1x128xf32>
    %161 = arith.mulf %160, %135 : vector<1x128xf32>
    %162 = arith.addf %146, %161 : vector<1x128xf32>
    %c49 = arith.constant 49 : index
    %163 = memref.load %arg3[%c49] : memref<96xf32, #tpu.memory_space<smem>>
    %164 = vector.broadcast %163 : f32 to vector<1x128xf32>
    %165 = arith.mulf %164, %135 : vector<1x128xf32>
    %166 = arith.addf %150, %165 : vector<1x128xf32>
    %c73 = arith.constant 73 : index
    %167 = memref.load %arg3[%c73] : memref<96xf32, #tpu.memory_space<smem>>
    %168 = vector.broadcast %167 : f32 to vector<1x128xf32>
    %169 = arith.mulf %168, %135 : vector<1x128xf32>
    %170 = arith.addf %154, %169 : vector<1x128xf32>
    %c127_i32_81 = arith.constant 127 : i32
    %171 = tpu.dynamic_rotate %135 by %c127_i32_81 dim 1 : vector<1x128xf32>, i32 -> vector<1x128xf32>
    %cst_82 = arith.constant 0.000000e+00 : f32
    %172 = vector.broadcast %cst_82 : f32 to vector<1x128xf32>
    %173 = arith.select %25, %171, %172 : vector<1x128xi1>, vector<1x128xf32>
    %c2_83 = arith.constant 2 : index
    %174 = memref.load %arg3[%c2_83] : memref<96xf32, #tpu.memory_space<smem>>
    %175 = vector.broadcast %174 : f32 to vector<1x128xf32>
    %176 = arith.mulf %175, %173 : vector<1x128xf32>
    %177 = arith.addf %158, %176 : vector<1x128xf32>
    %c26 = arith.constant 26 : index
    %178 = memref.load %arg3[%c26] : memref<96xf32, #tpu.memory_space<smem>>
    %179 = vector.broadcast %178 : f32 to vector<1x128xf32>
    %180 = arith.mulf %179, %173 : vector<1x128xf32>
    %181 = arith.addf %162, %180 : vector<1x128xf32>
    %c50 = arith.constant 50 : index
    %182 = memref.load %arg3[%c50] : memref<96xf32, #tpu.memory_space<smem>>
    %183 = vector.broadcast %182 : f32 to vector<1x128xf32>
    %184 = arith.mulf %183, %173 : vector<1x128xf32>
    %185 = arith.addf %166, %184 : vector<1x128xf32>
    %c74 = arith.constant 74 : index
    %186 = memref.load %arg3[%c74] : memref<96xf32, #tpu.memory_space<smem>>
    %187 = vector.broadcast %186 : f32 to vector<1x128xf32>
    %188 = arith.mulf %187, %173 : vector<1x128xf32>
    %189 = arith.addf %170, %188 : vector<1x128xf32>
    %cst_84 = arith.constant 0.000000e+00 : f32
    %190 = vector.broadcast %cst_84 : f32 to vector<1x128xf32>
    %c12 = arith.constant 12 : index
    %191 = memref.load %arg2[%c12] : memref<96xf32, #tpu.memory_space<smem>>
    %192 = vector.broadcast %191 : f32 to vector<1x128xf32>
    %193 = arith.mulf %192, %39 : vector<1x128xf32>
    %194 = arith.addf %190, %193 : vector<1x128xf32>
    %c13 = arith.constant 13 : index
    %195 = memref.load %arg2[%c13] : memref<96xf32, #tpu.memory_space<smem>>
    %196 = vector.broadcast %195 : f32 to vector<1x128xf32>
    %197 = arith.mulf %196, %41 : vector<1x128xf32>
    %198 = arith.addf %194, %197 : vector<1x128xf32>
    %c14 = arith.constant 14 : index
    %199 = memref.load %arg2[%c14] : memref<96xf32, #tpu.memory_space<smem>>
    %200 = vector.broadcast %199 : f32 to vector<1x128xf32>
    %201 = arith.mulf %200, %46 : vector<1x128xf32>
    %202 = arith.addf %198, %201 : vector<1x128xf32>
    %c15 = arith.constant 15 : index
    %203 = memref.load %arg2[%c15] : memref<96xf32, #tpu.memory_space<smem>>
    %204 = vector.broadcast %203 : f32 to vector<1x128xf32>
    %205 = arith.mulf %204, %51 : vector<1x128xf32>
    %206 = arith.addf %202, %205 : vector<1x128xf32>
    %c16 = arith.constant 16 : index
    %207 = memref.load %arg2[%c16] : memref<96xf32, #tpu.memory_space<smem>>
    %208 = vector.broadcast %207 : f32 to vector<1x128xf32>
    %209 = arith.mulf %208, %53 : vector<1x128xf32>
    %210 = arith.addf %206, %209 : vector<1x128xf32>
    %c17 = arith.constant 17 : index
    %211 = memref.load %arg2[%c17] : memref<96xf32, #tpu.memory_space<smem>>
    %212 = vector.broadcast %211 : f32 to vector<1x128xf32>
    %213 = arith.mulf %212, %58 : vector<1x128xf32>
    %214 = arith.addf %210, %213 : vector<1x128xf32>
    %c18 = arith.constant 18 : index
    %215 = memref.load %arg2[%c18] : memref<96xf32, #tpu.memory_space<smem>>
    %216 = vector.broadcast %215 : f32 to vector<1x128xf32>
    %217 = arith.mulf %216, %63 : vector<1x128xf32>
    %218 = arith.addf %214, %217 : vector<1x128xf32>
    %c19 = arith.constant 19 : index
    %219 = memref.load %arg2[%c19] : memref<96xf32, #tpu.memory_space<smem>>
    %220 = vector.broadcast %219 : f32 to vector<1x128xf32>
    %221 = arith.mulf %220, %65 : vector<1x128xf32>
    %222 = arith.addf %218, %221 : vector<1x128xf32>
    %c20 = arith.constant 20 : index
    %223 = memref.load %arg2[%c20] : memref<96xf32, #tpu.memory_space<smem>>
    %224 = vector.broadcast %223 : f32 to vector<1x128xf32>
    %225 = arith.mulf %224, %70 : vector<1x128xf32>
    %226 = arith.addf %222, %225 : vector<1x128xf32>
    %c21 = arith.constant 21 : index
    %227 = memref.load %arg2[%c21] : memref<96xf32, #tpu.memory_space<smem>>
    %228 = vector.broadcast %227 : f32 to vector<1x128xf32>
    %229 = arith.mulf %228, %75 : vector<1x128xf32>
    %230 = arith.addf %226, %229 : vector<1x128xf32>
    %c22 = arith.constant 22 : index
    %231 = memref.load %arg2[%c22] : memref<96xf32, #tpu.memory_space<smem>>
    %232 = vector.broadcast %231 : f32 to vector<1x128xf32>
    %233 = arith.mulf %232, %77 : vector<1x128xf32>
    %234 = arith.addf %230, %233 : vector<1x128xf32>
    %c23 = arith.constant 23 : index
    %235 = memref.load %arg2[%c23] : memref<96xf32, #tpu.memory_space<smem>>
    %236 = vector.broadcast %235 : f32 to vector<1x128xf32>
    %237 = arith.mulf %236, %82 : vector<1x128xf32>
    %238 = arith.addf %234, %237 : vector<1x128xf32>
    %c1_i32_85 = arith.constant 1 : i32
    %239 = tpu.dynamic_rotate %238 by %c1_i32_85 dim 1 : vector<1x128xf32>, i32 -> vector<1x128xf32>
    %cst_86 = arith.constant 0.000000e+00 : f32
    %240 = vector.broadcast %cst_86 : f32 to vector<1x128xf32>
    %241 = arith.select %34, %239, %240 : vector<1x128xi1>, vector<1x128xf32>
    %c3_87 = arith.constant 3 : index
    %242 = memref.load %arg3[%c3_87] : memref<96xf32, #tpu.memory_space<smem>>
    %243 = vector.broadcast %242 : f32 to vector<1x128xf32>
    %244 = arith.mulf %243, %241 : vector<1x128xf32>
    %245 = arith.addf %177, %244 : vector<1x128xf32>
    %c27 = arith.constant 27 : index
    %246 = memref.load %arg3[%c27] : memref<96xf32, #tpu.memory_space<smem>>
    %247 = vector.broadcast %246 : f32 to vector<1x128xf32>
    %248 = arith.mulf %247, %241 : vector<1x128xf32>
    %249 = arith.addf %181, %248 : vector<1x128xf32>
    %c51 = arith.constant 51 : index
    %250 = memref.load %arg3[%c51] : memref<96xf32, #tpu.memory_space<smem>>
    %251 = vector.broadcast %250 : f32 to vector<1x128xf32>
    %252 = arith.mulf %251, %241 : vector<1x128xf32>
    %253 = arith.addf %185, %252 : vector<1x128xf32>
    %c75 = arith.constant 75 : index
    %254 = memref.load %arg3[%c75] : memref<96xf32, #tpu.memory_space<smem>>
    %255 = vector.broadcast %254 : f32 to vector<1x128xf32>
    %256 = arith.mulf %255, %241 : vector<1x128xf32>
    %257 = arith.addf %189, %256 : vector<1x128xf32>
    %c4_88 = arith.constant 4 : index
    %258 = memref.load %arg3[%c4_88] : memref<96xf32, #tpu.memory_space<smem>>
    %259 = vector.broadcast %258 : f32 to vector<1x128xf32>
    %260 = arith.mulf %259, %238 : vector<1x128xf32>
    %261 = arith.addf %245, %260 : vector<1x128xf32>
    %c28 = arith.constant 28 : index
    %262 = memref.load %arg3[%c28] : memref<96xf32, #tpu.memory_space<smem>>
    %263 = vector.broadcast %262 : f32 to vector<1x128xf32>
    %264 = arith.mulf %263, %238 : vector<1x128xf32>
    %265 = arith.addf %249, %264 : vector<1x128xf32>
    %c52 = arith.constant 52 : index
    %266 = memref.load %arg3[%c52] : memref<96xf32, #tpu.memory_space<smem>>
    %267 = vector.broadcast %266 : f32 to vector<1x128xf32>
    %268 = arith.mulf %267, %238 : vector<1x128xf32>
    %269 = arith.addf %253, %268 : vector<1x128xf32>
    %c76 = arith.constant 76 : index
    %270 = memref.load %arg3[%c76] : memref<96xf32, #tpu.memory_space<smem>>
    %271 = vector.broadcast %270 : f32 to vector<1x128xf32>
    %272 = arith.mulf %271, %238 : vector<1x128xf32>
    %273 = arith.addf %257, %272 : vector<1x128xf32>
    %c127_i32_89 = arith.constant 127 : i32
    %274 = tpu.dynamic_rotate %238 by %c127_i32_89 dim 1 : vector<1x128xf32>, i32 -> vector<1x128xf32>
    %cst_90 = arith.constant 0.000000e+00 : f32
    %275 = vector.broadcast %cst_90 : f32 to vector<1x128xf32>
    %276 = arith.select %25, %274, %275 : vector<1x128xi1>, vector<1x128xf32>
    %c5_91 = arith.constant 5 : index
    %277 = memref.load %arg3[%c5_91] : memref<96xf32, #tpu.memory_space<smem>>
    %278 = vector.broadcast %277 : f32 to vector<1x128xf32>
    %279 = arith.mulf %278, %276 : vector<1x128xf32>
    %280 = arith.addf %261, %279 : vector<1x128xf32>
    %c29 = arith.constant 29 : index
    %281 = memref.load %arg3[%c29] : memref<96xf32, #tpu.memory_space<smem>>
    %282 = vector.broadcast %281 : f32 to vector<1x128xf32>
    %283 = arith.mulf %282, %276 : vector<1x128xf32>
    %284 = arith.addf %265, %283 : vector<1x128xf32>
    %c53 = arith.constant 53 : index
    %285 = memref.load %arg3[%c53] : memref<96xf32, #tpu.memory_space<smem>>
    %286 = vector.broadcast %285 : f32 to vector<1x128xf32>
    %287 = arith.mulf %286, %276 : vector<1x128xf32>
    %288 = arith.addf %269, %287 : vector<1x128xf32>
    %c77 = arith.constant 77 : index
    %289 = memref.load %arg3[%c77] : memref<96xf32, #tpu.memory_space<smem>>
    %290 = vector.broadcast %289 : f32 to vector<1x128xf32>
    %291 = arith.mulf %290, %276 : vector<1x128xf32>
    %292 = arith.addf %273, %291 : vector<1x128xf32>
    %cst_92 = arith.constant 0.000000e+00 : f32
    %293 = vector.broadcast %cst_92 : f32 to vector<1x128xf32>
    %c24_93 = arith.constant 24 : index
    %294 = memref.load %arg2[%c24_93] : memref<96xf32, #tpu.memory_space<smem>>
    %295 = vector.broadcast %294 : f32 to vector<1x128xf32>
    %296 = arith.mulf %295, %39 : vector<1x128xf32>
    %297 = arith.addf %293, %296 : vector<1x128xf32>
    %c25_94 = arith.constant 25 : index
    %298 = memref.load %arg2[%c25_94] : memref<96xf32, #tpu.memory_space<smem>>
    %299 = vector.broadcast %298 : f32 to vector<1x128xf32>
    %300 = arith.mulf %299, %41 : vector<1x128xf32>
    %301 = arith.addf %297, %300 : vector<1x128xf32>
    %c26_95 = arith.constant 26 : index
    %302 = memref.load %arg2[%c26_95] : memref<96xf32, #tpu.memory_space<smem>>
    %303 = vector.broadcast %302 : f32 to vector<1x128xf32>
    %304 = arith.mulf %303, %46 : vector<1x128xf32>
    %305 = arith.addf %301, %304 : vector<1x128xf32>
    %c27_96 = arith.constant 27 : index
    %306 = memref.load %arg2[%c27_96] : memref<96xf32, #tpu.memory_space<smem>>
    %307 = vector.broadcast %306 : f32 to vector<1x128xf32>
    %308 = arith.mulf %307, %51 : vector<1x128xf32>
    %309 = arith.addf %305, %308 : vector<1x128xf32>
    %c28_97 = arith.constant 28 : index
    %310 = memref.load %arg2[%c28_97] : memref<96xf32, #tpu.memory_space<smem>>
    %311 = vector.broadcast %310 : f32 to vector<1x128xf32>
    %312 = arith.mulf %311, %53 : vector<1x128xf32>
    %313 = arith.addf %309, %312 : vector<1x128xf32>
    %c29_98 = arith.constant 29 : index
    %314 = memref.load %arg2[%c29_98] : memref<96xf32, #tpu.memory_space<smem>>
    %315 = vector.broadcast %314 : f32 to vector<1x128xf32>
    %316 = arith.mulf %315, %58 : vector<1x128xf32>
    %317 = arith.addf %313, %316 : vector<1x128xf32>
    %c30 = arith.constant 30 : index
    %318 = memref.load %arg2[%c30] : memref<96xf32, #tpu.memory_space<smem>>
    %319 = vector.broadcast %318 : f32 to vector<1x128xf32>
    %320 = arith.mulf %319, %63 : vector<1x128xf32>
    %321 = arith.addf %317, %320 : vector<1x128xf32>
    %c31 = arith.constant 31 : index
    %322 = memref.load %arg2[%c31] : memref<96xf32, #tpu.memory_space<smem>>
    %323 = vector.broadcast %322 : f32 to vector<1x128xf32>
    %324 = arith.mulf %323, %65 : vector<1x128xf32>
    %325 = arith.addf %321, %324 : vector<1x128xf32>
    %c32 = arith.constant 32 : index
    %326 = memref.load %arg2[%c32] : memref<96xf32, #tpu.memory_space<smem>>
    %327 = vector.broadcast %326 : f32 to vector<1x128xf32>
    %328 = arith.mulf %327, %70 : vector<1x128xf32>
    %329 = arith.addf %325, %328 : vector<1x128xf32>
    %c33 = arith.constant 33 : index
    %330 = memref.load %arg2[%c33] : memref<96xf32, #tpu.memory_space<smem>>
    %331 = vector.broadcast %330 : f32 to vector<1x128xf32>
    %332 = arith.mulf %331, %75 : vector<1x128xf32>
    %333 = arith.addf %329, %332 : vector<1x128xf32>
    %c34 = arith.constant 34 : index
    %334 = memref.load %arg2[%c34] : memref<96xf32, #tpu.memory_space<smem>>
    %335 = vector.broadcast %334 : f32 to vector<1x128xf32>
    %336 = arith.mulf %335, %77 : vector<1x128xf32>
    %337 = arith.addf %333, %336 : vector<1x128xf32>
    %c35 = arith.constant 35 : index
    %338 = memref.load %arg2[%c35] : memref<96xf32, #tpu.memory_space<smem>>
    %339 = vector.broadcast %338 : f32 to vector<1x128xf32>
    %340 = arith.mulf %339, %82 : vector<1x128xf32>
    %341 = arith.addf %337, %340 : vector<1x128xf32>
    %c1_i32_99 = arith.constant 1 : i32
    %342 = tpu.dynamic_rotate %341 by %c1_i32_99 dim 1 : vector<1x128xf32>, i32 -> vector<1x128xf32>
    %cst_100 = arith.constant 0.000000e+00 : f32
    %343 = vector.broadcast %cst_100 : f32 to vector<1x128xf32>
    %344 = arith.select %34, %342, %343 : vector<1x128xi1>, vector<1x128xf32>
    %c6_101 = arith.constant 6 : index
    %345 = memref.load %arg3[%c6_101] : memref<96xf32, #tpu.memory_space<smem>>
    %346 = vector.broadcast %345 : f32 to vector<1x128xf32>
    %347 = arith.mulf %346, %344 : vector<1x128xf32>
    %348 = arith.addf %280, %347 : vector<1x128xf32>
    %c30_102 = arith.constant 30 : index
    %349 = memref.load %arg3[%c30_102] : memref<96xf32, #tpu.memory_space<smem>>
    %350 = vector.broadcast %349 : f32 to vector<1x128xf32>
    %351 = arith.mulf %350, %344 : vector<1x128xf32>
    %352 = arith.addf %284, %351 : vector<1x128xf32>
    %c54 = arith.constant 54 : index
    %353 = memref.load %arg3[%c54] : memref<96xf32, #tpu.memory_space<smem>>
    %354 = vector.broadcast %353 : f32 to vector<1x128xf32>
    %355 = arith.mulf %354, %344 : vector<1x128xf32>
    %356 = arith.addf %288, %355 : vector<1x128xf32>
    %c78 = arith.constant 78 : index
    %357 = memref.load %arg3[%c78] : memref<96xf32, #tpu.memory_space<smem>>
    %358 = vector.broadcast %357 : f32 to vector<1x128xf32>
    %359 = arith.mulf %358, %344 : vector<1x128xf32>
    %360 = arith.addf %292, %359 : vector<1x128xf32>
    %c7_103 = arith.constant 7 : index
    %361 = memref.load %arg3[%c7_103] : memref<96xf32, #tpu.memory_space<smem>>
    %362 = vector.broadcast %361 : f32 to vector<1x128xf32>
    %363 = arith.mulf %362, %341 : vector<1x128xf32>
    %364 = arith.addf %348, %363 : vector<1x128xf32>
    %c31_104 = arith.constant 31 : index
    %365 = memref.load %arg3[%c31_104] : memref<96xf32, #tpu.memory_space<smem>>
    %366 = vector.broadcast %365 : f32 to vector<1x128xf32>
    %367 = arith.mulf %366, %341 : vector<1x128xf32>
    %368 = arith.addf %352, %367 : vector<1x128xf32>
    %c55 = arith.constant 55 : index
    %369 = memref.load %arg3[%c55] : memref<96xf32, #tpu.memory_space<smem>>
    %370 = vector.broadcast %369 : f32 to vector<1x128xf32>
    %371 = arith.mulf %370, %341 : vector<1x128xf32>
    %372 = arith.addf %356, %371 : vector<1x128xf32>
    %c79 = arith.constant 79 : index
    %373 = memref.load %arg3[%c79] : memref<96xf32, #tpu.memory_space<smem>>
    %374 = vector.broadcast %373 : f32 to vector<1x128xf32>
    %375 = arith.mulf %374, %341 : vector<1x128xf32>
    %376 = arith.addf %360, %375 : vector<1x128xf32>
    %c127_i32_105 = arith.constant 127 : i32
    %377 = tpu.dynamic_rotate %341 by %c127_i32_105 dim 1 : vector<1x128xf32>, i32 -> vector<1x128xf32>
    %cst_106 = arith.constant 0.000000e+00 : f32
    %378 = vector.broadcast %cst_106 : f32 to vector<1x128xf32>
    %379 = arith.select %25, %377, %378 : vector<1x128xi1>, vector<1x128xf32>
    %c8_107 = arith.constant 8 : index
    %380 = memref.load %arg3[%c8_107] : memref<96xf32, #tpu.memory_space<smem>>
    %381 = vector.broadcast %380 : f32 to vector<1x128xf32>
    %382 = arith.mulf %381, %379 : vector<1x128xf32>
    %383 = arith.addf %364, %382 : vector<1x128xf32>
    %c32_108 = arith.constant 32 : index
    %384 = memref.load %arg3[%c32_108] : memref<96xf32, #tpu.memory_space<smem>>
    %385 = vector.broadcast %384 : f32 to vector<1x128xf32>
    %386 = arith.mulf %385, %379 : vector<1x128xf32>
    %387 = arith.addf %368, %386 : vector<1x128xf32>
    %c56 = arith.constant 56 : index
    %388 = memref.load %arg3[%c56] : memref<96xf32, #tpu.memory_space<smem>>
    %389 = vector.broadcast %388 : f32 to vector<1x128xf32>
    %390 = arith.mulf %389, %379 : vector<1x128xf32>
    %391 = arith.addf %372, %390 : vector<1x128xf32>
    %c80 = arith.constant 80 : index
    %392 = memref.load %arg3[%c80] : memref<96xf32, #tpu.memory_space<smem>>
    %393 = vector.broadcast %392 : f32 to vector<1x128xf32>
    %394 = arith.mulf %393, %379 : vector<1x128xf32>
    %395 = arith.addf %376, %394 : vector<1x128xf32>
    %cst_109 = arith.constant 0.000000e+00 : f32
    %396 = vector.broadcast %cst_109 : f32 to vector<1x128xf32>
    %c36 = arith.constant 36 : index
    %397 = memref.load %arg2[%c36] : memref<96xf32, #tpu.memory_space<smem>>
    %398 = vector.broadcast %397 : f32 to vector<1x128xf32>
    %399 = arith.mulf %398, %39 : vector<1x128xf32>
    %400 = arith.addf %396, %399 : vector<1x128xf32>
    %c37 = arith.constant 37 : index
    %401 = memref.load %arg2[%c37] : memref<96xf32, #tpu.memory_space<smem>>
    %402 = vector.broadcast %401 : f32 to vector<1x128xf32>
    %403 = arith.mulf %402, %41 : vector<1x128xf32>
    %404 = arith.addf %400, %403 : vector<1x128xf32>
    %c38 = arith.constant 38 : index
    %405 = memref.load %arg2[%c38] : memref<96xf32, #tpu.memory_space<smem>>
    %406 = vector.broadcast %405 : f32 to vector<1x128xf32>
    %407 = arith.mulf %406, %46 : vector<1x128xf32>
    %408 = arith.addf %404, %407 : vector<1x128xf32>
    %c39 = arith.constant 39 : index
    %409 = memref.load %arg2[%c39] : memref<96xf32, #tpu.memory_space<smem>>
    %410 = vector.broadcast %409 : f32 to vector<1x128xf32>
    %411 = arith.mulf %410, %51 : vector<1x128xf32>
    %412 = arith.addf %408, %411 : vector<1x128xf32>
    %c40 = arith.constant 40 : index
    %413 = memref.load %arg2[%c40] : memref<96xf32, #tpu.memory_space<smem>>
    %414 = vector.broadcast %413 : f32 to vector<1x128xf32>
    %415 = arith.mulf %414, %53 : vector<1x128xf32>
    %416 = arith.addf %412, %415 : vector<1x128xf32>
    %c41 = arith.constant 41 : index
    %417 = memref.load %arg2[%c41] : memref<96xf32, #tpu.memory_space<smem>>
    %418 = vector.broadcast %417 : f32 to vector<1x128xf32>
    %419 = arith.mulf %418, %58 : vector<1x128xf32>
    %420 = arith.addf %416, %419 : vector<1x128xf32>
    %c42 = arith.constant 42 : index
    %421 = memref.load %arg2[%c42] : memref<96xf32, #tpu.memory_space<smem>>
    %422 = vector.broadcast %421 : f32 to vector<1x128xf32>
    %423 = arith.mulf %422, %63 : vector<1x128xf32>
    %424 = arith.addf %420, %423 : vector<1x128xf32>
    %c43 = arith.constant 43 : index
    %425 = memref.load %arg2[%c43] : memref<96xf32, #tpu.memory_space<smem>>
    %426 = vector.broadcast %425 : f32 to vector<1x128xf32>
    %427 = arith.mulf %426, %65 : vector<1x128xf32>
    %428 = arith.addf %424, %427 : vector<1x128xf32>
    %c44 = arith.constant 44 : index
    %429 = memref.load %arg2[%c44] : memref<96xf32, #tpu.memory_space<smem>>
    %430 = vector.broadcast %429 : f32 to vector<1x128xf32>
    %431 = arith.mulf %430, %70 : vector<1x128xf32>
    %432 = arith.addf %428, %431 : vector<1x128xf32>
    %c45 = arith.constant 45 : index
    %433 = memref.load %arg2[%c45] : memref<96xf32, #tpu.memory_space<smem>>
    %434 = vector.broadcast %433 : f32 to vector<1x128xf32>
    %435 = arith.mulf %434, %75 : vector<1x128xf32>
    %436 = arith.addf %432, %435 : vector<1x128xf32>
    %c46 = arith.constant 46 : index
    %437 = memref.load %arg2[%c46] : memref<96xf32, #tpu.memory_space<smem>>
    %438 = vector.broadcast %437 : f32 to vector<1x128xf32>
    %439 = arith.mulf %438, %77 : vector<1x128xf32>
    %440 = arith.addf %436, %439 : vector<1x128xf32>
    %c47 = arith.constant 47 : index
    %441 = memref.load %arg2[%c47] : memref<96xf32, #tpu.memory_space<smem>>
    %442 = vector.broadcast %441 : f32 to vector<1x128xf32>
    %443 = arith.mulf %442, %82 : vector<1x128xf32>
    %444 = arith.addf %440, %443 : vector<1x128xf32>
    %c1_i32_110 = arith.constant 1 : i32
    %445 = tpu.dynamic_rotate %444 by %c1_i32_110 dim 1 : vector<1x128xf32>, i32 -> vector<1x128xf32>
    %cst_111 = arith.constant 0.000000e+00 : f32
    %446 = vector.broadcast %cst_111 : f32 to vector<1x128xf32>
    %447 = arith.select %34, %445, %446 : vector<1x128xi1>, vector<1x128xf32>
    %c9_112 = arith.constant 9 : index
    %448 = memref.load %arg3[%c9_112] : memref<96xf32, #tpu.memory_space<smem>>
    %449 = vector.broadcast %448 : f32 to vector<1x128xf32>
    %450 = arith.mulf %449, %447 : vector<1x128xf32>
    %451 = arith.addf %383, %450 : vector<1x128xf32>
    %c33_113 = arith.constant 33 : index
    %452 = memref.load %arg3[%c33_113] : memref<96xf32, #tpu.memory_space<smem>>
    %453 = vector.broadcast %452 : f32 to vector<1x128xf32>
    %454 = arith.mulf %453, %447 : vector<1x128xf32>
    %455 = arith.addf %387, %454 : vector<1x128xf32>
    %c57 = arith.constant 57 : index
    %456 = memref.load %arg3[%c57] : memref<96xf32, #tpu.memory_space<smem>>
    %457 = vector.broadcast %456 : f32 to vector<1x128xf32>
    %458 = arith.mulf %457, %447 : vector<1x128xf32>
    %459 = arith.addf %391, %458 : vector<1x128xf32>
    %c81 = arith.constant 81 : index
    %460 = memref.load %arg3[%c81] : memref<96xf32, #tpu.memory_space<smem>>
    %461 = vector.broadcast %460 : f32 to vector<1x128xf32>
    %462 = arith.mulf %461, %447 : vector<1x128xf32>
    %463 = arith.addf %395, %462 : vector<1x128xf32>
    %c10_114 = arith.constant 10 : index
    %464 = memref.load %arg3[%c10_114] : memref<96xf32, #tpu.memory_space<smem>>
    %465 = vector.broadcast %464 : f32 to vector<1x128xf32>
    %466 = arith.mulf %465, %444 : vector<1x128xf32>
    %467 = arith.addf %451, %466 : vector<1x128xf32>
    %c34_115 = arith.constant 34 : index
    %468 = memref.load %arg3[%c34_115] : memref<96xf32, #tpu.memory_space<smem>>
    %469 = vector.broadcast %468 : f32 to vector<1x128xf32>
    %470 = arith.mulf %469, %444 : vector<1x128xf32>
    %471 = arith.addf %455, %470 : vector<1x128xf32>
    %c58 = arith.constant 58 : index
    %472 = memref.load %arg3[%c58] : memref<96xf32, #tpu.memory_space<smem>>
    %473 = vector.broadcast %472 : f32 to vector<1x128xf32>
    %474 = arith.mulf %473, %444 : vector<1x128xf32>
    %475 = arith.addf %459, %474 : vector<1x128xf32>
    %c82 = arith.constant 82 : index
    %476 = memref.load %arg3[%c82] : memref<96xf32, #tpu.memory_space<smem>>
    %477 = vector.broadcast %476 : f32 to vector<1x128xf32>
    %478 = arith.mulf %477, %444 : vector<1x128xf32>
    %479 = arith.addf %463, %478 : vector<1x128xf32>
    %c127_i32_116 = arith.constant 127 : i32
    %480 = tpu.dynamic_rotate %444 by %c127_i32_116 dim 1 : vector<1x128xf32>, i32 -> vector<1x128xf32>
    %cst_117 = arith.constant 0.000000e+00 : f32
    %481 = vector.broadcast %cst_117 : f32 to vector<1x128xf32>
    %482 = arith.select %25, %480, %481 : vector<1x128xi1>, vector<1x128xf32>
    %c11_118 = arith.constant 11 : index
    %483 = memref.load %arg3[%c11_118] : memref<96xf32, #tpu.memory_space<smem>>
    %484 = vector.broadcast %483 : f32 to vector<1x128xf32>
    %485 = arith.mulf %484, %482 : vector<1x128xf32>
    %486 = arith.addf %467, %485 : vector<1x128xf32>
    %c35_119 = arith.constant 35 : index
    %487 = memref.load %arg3[%c35_119] : memref<96xf32, #tpu.memory_space<smem>>
    %488 = vector.broadcast %487 : f32 to vector<1x128xf32>
    %489 = arith.mulf %488, %482 : vector<1x128xf32>
    %490 = arith.addf %471, %489 : vector<1x128xf32>
    %c59 = arith.constant 59 : index
    %491 = memref.load %arg3[%c59] : memref<96xf32, #tpu.memory_space<smem>>
    %492 = vector.broadcast %491 : f32 to vector<1x128xf32>
    %493 = arith.mulf %492, %482 : vector<1x128xf32>
    %494 = arith.addf %475, %493 : vector<1x128xf32>
    %c83 = arith.constant 83 : index
    %495 = memref.load %arg3[%c83] : memref<96xf32, #tpu.memory_space<smem>>
    %496 = vector.broadcast %495 : f32 to vector<1x128xf32>
    %497 = arith.mulf %496, %482 : vector<1x128xf32>
    %498 = arith.addf %479, %497 : vector<1x128xf32>
    %cst_120 = arith.constant 0.000000e+00 : f32
    %499 = vector.broadcast %cst_120 : f32 to vector<1x128xf32>
    %c48_121 = arith.constant 48 : index
    %500 = memref.load %arg2[%c48_121] : memref<96xf32, #tpu.memory_space<smem>>
    %501 = vector.broadcast %500 : f32 to vector<1x128xf32>
    %502 = arith.mulf %501, %39 : vector<1x128xf32>
    %503 = arith.addf %499, %502 : vector<1x128xf32>
    %c49_122 = arith.constant 49 : index
    %504 = memref.load %arg2[%c49_122] : memref<96xf32, #tpu.memory_space<smem>>
    %505 = vector.broadcast %504 : f32 to vector<1x128xf32>
    %506 = arith.mulf %505, %41 : vector<1x128xf32>
    %507 = arith.addf %503, %506 : vector<1x128xf32>
    %c50_123 = arith.constant 50 : index
    %508 = memref.load %arg2[%c50_123] : memref<96xf32, #tpu.memory_space<smem>>
    %509 = vector.broadcast %508 : f32 to vector<1x128xf32>
    %510 = arith.mulf %509, %46 : vector<1x128xf32>
    %511 = arith.addf %507, %510 : vector<1x128xf32>
    %c51_124 = arith.constant 51 : index
    %512 = memref.load %arg2[%c51_124] : memref<96xf32, #tpu.memory_space<smem>>
    %513 = vector.broadcast %512 : f32 to vector<1x128xf32>
    %514 = arith.mulf %513, %51 : vector<1x128xf32>
    %515 = arith.addf %511, %514 : vector<1x128xf32>
    %c52_125 = arith.constant 52 : index
    %516 = memref.load %arg2[%c52_125] : memref<96xf32, #tpu.memory_space<smem>>
    %517 = vector.broadcast %516 : f32 to vector<1x128xf32>
    %518 = arith.mulf %517, %53 : vector<1x128xf32>
    %519 = arith.addf %515, %518 : vector<1x128xf32>
    %c53_126 = arith.constant 53 : index
    %520 = memref.load %arg2[%c53_126] : memref<96xf32, #tpu.memory_space<smem>>
    %521 = vector.broadcast %520 : f32 to vector<1x128xf32>
    %522 = arith.mulf %521, %58 : vector<1x128xf32>
    %523 = arith.addf %519, %522 : vector<1x128xf32>
    %c54_127 = arith.constant 54 : index
    %524 = memref.load %arg2[%c54_127] : memref<96xf32, #tpu.memory_space<smem>>
    %525 = vector.broadcast %524 : f32 to vector<1x128xf32>
    %526 = arith.mulf %525, %63 : vector<1x128xf32>
    %527 = arith.addf %523, %526 : vector<1x128xf32>
    %c55_128 = arith.constant 55 : index
    %528 = memref.load %arg2[%c55_128] : memref<96xf32, #tpu.memory_space<smem>>
    %529 = vector.broadcast %528 : f32 to vector<1x128xf32>
    %530 = arith.mulf %529, %65 : vector<1x128xf32>
    %531 = arith.addf %527, %530 : vector<1x128xf32>
    %c56_129 = arith.constant 56 : index
    %532 = memref.load %arg2[%c56_129] : memref<96xf32, #tpu.memory_space<smem>>
    %533 = vector.broadcast %532 : f32 to vector<1x128xf32>
    %534 = arith.mulf %533, %70 : vector<1x128xf32>
    %535 = arith.addf %531, %534 : vector<1x128xf32>
    %c57_130 = arith.constant 57 : index
    %536 = memref.load %arg2[%c57_130] : memref<96xf32, #tpu.memory_space<smem>>
    %537 = vector.broadcast %536 : f32 to vector<1x128xf32>
    %538 = arith.mulf %537, %75 : vector<1x128xf32>
    %539 = arith.addf %535, %538 : vector<1x128xf32>
    %c58_131 = arith.constant 58 : index
    %540 = memref.load %arg2[%c58_131] : memref<96xf32, #tpu.memory_space<smem>>
    %541 = vector.broadcast %540 : f32 to vector<1x128xf32>
    %542 = arith.mulf %541, %77 : vector<1x128xf32>
    %543 = arith.addf %539, %542 : vector<1x128xf32>
    %c59_132 = arith.constant 59 : index
    %544 = memref.load %arg2[%c59_132] : memref<96xf32, #tpu.memory_space<smem>>
    %545 = vector.broadcast %544 : f32 to vector<1x128xf32>
    %546 = arith.mulf %545, %82 : vector<1x128xf32>
    %547 = arith.addf %543, %546 : vector<1x128xf32>
    %c1_i32_133 = arith.constant 1 : i32
    %548 = tpu.dynamic_rotate %547 by %c1_i32_133 dim 1 : vector<1x128xf32>, i32 -> vector<1x128xf32>
    %cst_134 = arith.constant 0.000000e+00 : f32
    %549 = vector.broadcast %cst_134 : f32 to vector<1x128xf32>
    %550 = arith.select %34, %548, %549 : vector<1x128xi1>, vector<1x128xf32>
    %c12_135 = arith.constant 12 : index
    %551 = memref.load %arg3[%c12_135] : memref<96xf32, #tpu.memory_space<smem>>
    %552 = vector.broadcast %551 : f32 to vector<1x128xf32>
    %553 = arith.mulf %552, %550 : vector<1x128xf32>
    %554 = arith.addf %486, %553 : vector<1x128xf32>
    %c36_136 = arith.constant 36 : index
    %555 = memref.load %arg3[%c36_136] : memref<96xf32, #tpu.memory_space<smem>>
    %556 = vector.broadcast %555 : f32 to vector<1x128xf32>
    %557 = arith.mulf %556, %550 : vector<1x128xf32>
    %558 = arith.addf %490, %557 : vector<1x128xf32>
    %c60 = arith.constant 60 : index
    %559 = memref.load %arg3[%c60] : memref<96xf32, #tpu.memory_space<smem>>
    %560 = vector.broadcast %559 : f32 to vector<1x128xf32>
    %561 = arith.mulf %560, %550 : vector<1x128xf32>
    %562 = arith.addf %494, %561 : vector<1x128xf32>
    %c84 = arith.constant 84 : index
    %563 = memref.load %arg3[%c84] : memref<96xf32, #tpu.memory_space<smem>>
    %564 = vector.broadcast %563 : f32 to vector<1x128xf32>
    %565 = arith.mulf %564, %550 : vector<1x128xf32>
    %566 = arith.addf %498, %565 : vector<1x128xf32>
    %c13_137 = arith.constant 13 : index
    %567 = memref.load %arg3[%c13_137] : memref<96xf32, #tpu.memory_space<smem>>
    %568 = vector.broadcast %567 : f32 to vector<1x128xf32>
    %569 = arith.mulf %568, %547 : vector<1x128xf32>
    %570 = arith.addf %554, %569 : vector<1x128xf32>
    %c37_138 = arith.constant 37 : index
    %571 = memref.load %arg3[%c37_138] : memref<96xf32, #tpu.memory_space<smem>>
    %572 = vector.broadcast %571 : f32 to vector<1x128xf32>
    %573 = arith.mulf %572, %547 : vector<1x128xf32>
    %574 = arith.addf %558, %573 : vector<1x128xf32>
    %c61 = arith.constant 61 : index
    %575 = memref.load %arg3[%c61] : memref<96xf32, #tpu.memory_space<smem>>
    %576 = vector.broadcast %575 : f32 to vector<1x128xf32>
    %577 = arith.mulf %576, %547 : vector<1x128xf32>
    %578 = arith.addf %562, %577 : vector<1x128xf32>
    %c85 = arith.constant 85 : index
    %579 = memref.load %arg3[%c85] : memref<96xf32, #tpu.memory_space<smem>>
    %580 = vector.broadcast %579 : f32 to vector<1x128xf32>
    %581 = arith.mulf %580, %547 : vector<1x128xf32>
    %582 = arith.addf %566, %581 : vector<1x128xf32>
    %c127_i32_139 = arith.constant 127 : i32
    %583 = tpu.dynamic_rotate %547 by %c127_i32_139 dim 1 : vector<1x128xf32>, i32 -> vector<1x128xf32>
    %cst_140 = arith.constant 0.000000e+00 : f32
    %584 = vector.broadcast %cst_140 : f32 to vector<1x128xf32>
    %585 = arith.select %25, %583, %584 : vector<1x128xi1>, vector<1x128xf32>
    %c14_141 = arith.constant 14 : index
    %586 = memref.load %arg3[%c14_141] : memref<96xf32, #tpu.memory_space<smem>>
    %587 = vector.broadcast %586 : f32 to vector<1x128xf32>
    %588 = arith.mulf %587, %585 : vector<1x128xf32>
    %589 = arith.addf %570, %588 : vector<1x128xf32>
    %c38_142 = arith.constant 38 : index
    %590 = memref.load %arg3[%c38_142] : memref<96xf32, #tpu.memory_space<smem>>
    %591 = vector.broadcast %590 : f32 to vector<1x128xf32>
    %592 = arith.mulf %591, %585 : vector<1x128xf32>
    %593 = arith.addf %574, %592 : vector<1x128xf32>
    %c62 = arith.constant 62 : index
    %594 = memref.load %arg3[%c62] : memref<96xf32, #tpu.memory_space<smem>>
    %595 = vector.broadcast %594 : f32 to vector<1x128xf32>
    %596 = arith.mulf %595, %585 : vector<1x128xf32>
    %597 = arith.addf %578, %596 : vector<1x128xf32>
    %c86 = arith.constant 86 : index
    %598 = memref.load %arg3[%c86] : memref<96xf32, #tpu.memory_space<smem>>
    %599 = vector.broadcast %598 : f32 to vector<1x128xf32>
    %600 = arith.mulf %599, %585 : vector<1x128xf32>
    %601 = arith.addf %582, %600 : vector<1x128xf32>
    %cst_143 = arith.constant 0.000000e+00 : f32
    %602 = vector.broadcast %cst_143 : f32 to vector<1x128xf32>
    %c60_144 = arith.constant 60 : index
    %603 = memref.load %arg2[%c60_144] : memref<96xf32, #tpu.memory_space<smem>>
    %604 = vector.broadcast %603 : f32 to vector<1x128xf32>
    %605 = arith.mulf %604, %39 : vector<1x128xf32>
    %606 = arith.addf %602, %605 : vector<1x128xf32>
    %c61_145 = arith.constant 61 : index
    %607 = memref.load %arg2[%c61_145] : memref<96xf32, #tpu.memory_space<smem>>
    %608 = vector.broadcast %607 : f32 to vector<1x128xf32>
    %609 = arith.mulf %608, %41 : vector<1x128xf32>
    %610 = arith.addf %606, %609 : vector<1x128xf32>
    %c62_146 = arith.constant 62 : index
    %611 = memref.load %arg2[%c62_146] : memref<96xf32, #tpu.memory_space<smem>>
    %612 = vector.broadcast %611 : f32 to vector<1x128xf32>
    %613 = arith.mulf %612, %46 : vector<1x128xf32>
    %614 = arith.addf %610, %613 : vector<1x128xf32>
    %c63 = arith.constant 63 : index
    %615 = memref.load %arg2[%c63] : memref<96xf32, #tpu.memory_space<smem>>
    %616 = vector.broadcast %615 : f32 to vector<1x128xf32>
    %617 = arith.mulf %616, %51 : vector<1x128xf32>
    %618 = arith.addf %614, %617 : vector<1x128xf32>
    %c64 = arith.constant 64 : index
    %619 = memref.load %arg2[%c64] : memref<96xf32, #tpu.memory_space<smem>>
    %620 = vector.broadcast %619 : f32 to vector<1x128xf32>
    %621 = arith.mulf %620, %53 : vector<1x128xf32>
    %622 = arith.addf %618, %621 : vector<1x128xf32>
    %c65 = arith.constant 65 : index
    %623 = memref.load %arg2[%c65] : memref<96xf32, #tpu.memory_space<smem>>
    %624 = vector.broadcast %623 : f32 to vector<1x128xf32>
    %625 = arith.mulf %624, %58 : vector<1x128xf32>
    %626 = arith.addf %622, %625 : vector<1x128xf32>
    %c66 = arith.constant 66 : index
    %627 = memref.load %arg2[%c66] : memref<96xf32, #tpu.memory_space<smem>>
    %628 = vector.broadcast %627 : f32 to vector<1x128xf32>
    %629 = arith.mulf %628, %63 : vector<1x128xf32>
    %630 = arith.addf %626, %629 : vector<1x128xf32>
    %c67 = arith.constant 67 : index
    %631 = memref.load %arg2[%c67] : memref<96xf32, #tpu.memory_space<smem>>
    %632 = vector.broadcast %631 : f32 to vector<1x128xf32>
    %633 = arith.mulf %632, %65 : vector<1x128xf32>
    %634 = arith.addf %630, %633 : vector<1x128xf32>
    %c68 = arith.constant 68 : index
    %635 = memref.load %arg2[%c68] : memref<96xf32, #tpu.memory_space<smem>>
    %636 = vector.broadcast %635 : f32 to vector<1x128xf32>
    %637 = arith.mulf %636, %70 : vector<1x128xf32>
    %638 = arith.addf %634, %637 : vector<1x128xf32>
    %c69 = arith.constant 69 : index
    %639 = memref.load %arg2[%c69] : memref<96xf32, #tpu.memory_space<smem>>
    %640 = vector.broadcast %639 : f32 to vector<1x128xf32>
    %641 = arith.mulf %640, %75 : vector<1x128xf32>
    %642 = arith.addf %638, %641 : vector<1x128xf32>
    %c70 = arith.constant 70 : index
    %643 = memref.load %arg2[%c70] : memref<96xf32, #tpu.memory_space<smem>>
    %644 = vector.broadcast %643 : f32 to vector<1x128xf32>
    %645 = arith.mulf %644, %77 : vector<1x128xf32>
    %646 = arith.addf %642, %645 : vector<1x128xf32>
    %c71 = arith.constant 71 : index
    %647 = memref.load %arg2[%c71] : memref<96xf32, #tpu.memory_space<smem>>
    %648 = vector.broadcast %647 : f32 to vector<1x128xf32>
    %649 = arith.mulf %648, %82 : vector<1x128xf32>
    %650 = arith.addf %646, %649 : vector<1x128xf32>
    %c1_i32_147 = arith.constant 1 : i32
    %651 = tpu.dynamic_rotate %650 by %c1_i32_147 dim 1 : vector<1x128xf32>, i32 -> vector<1x128xf32>
    %cst_148 = arith.constant 0.000000e+00 : f32
    %652 = vector.broadcast %cst_148 : f32 to vector<1x128xf32>
    %653 = arith.select %34, %651, %652 : vector<1x128xi1>, vector<1x128xf32>
    %c15_149 = arith.constant 15 : index
    %654 = memref.load %arg3[%c15_149] : memref<96xf32, #tpu.memory_space<smem>>
    %655 = vector.broadcast %654 : f32 to vector<1x128xf32>
    %656 = arith.mulf %655, %653 : vector<1x128xf32>
    %657 = arith.addf %589, %656 : vector<1x128xf32>
    %c39_150 = arith.constant 39 : index
    %658 = memref.load %arg3[%c39_150] : memref<96xf32, #tpu.memory_space<smem>>
    %659 = vector.broadcast %658 : f32 to vector<1x128xf32>
    %660 = arith.mulf %659, %653 : vector<1x128xf32>
    %661 = arith.addf %593, %660 : vector<1x128xf32>
    %c63_151 = arith.constant 63 : index
    %662 = memref.load %arg3[%c63_151] : memref<96xf32, #tpu.memory_space<smem>>
    %663 = vector.broadcast %662 : f32 to vector<1x128xf32>
    %664 = arith.mulf %663, %653 : vector<1x128xf32>
    %665 = arith.addf %597, %664 : vector<1x128xf32>
    %c87 = arith.constant 87 : index
    %666 = memref.load %arg3[%c87] : memref<96xf32, #tpu.memory_space<smem>>
    %667 = vector.broadcast %666 : f32 to vector<1x128xf32>
    %668 = arith.mulf %667, %653 : vector<1x128xf32>
    %669 = arith.addf %601, %668 : vector<1x128xf32>
    %c16_152 = arith.constant 16 : index
    %670 = memref.load %arg3[%c16_152] : memref<96xf32, #tpu.memory_space<smem>>
    %671 = vector.broadcast %670 : f32 to vector<1x128xf32>
    %672 = arith.mulf %671, %650 : vector<1x128xf32>
    %673 = arith.addf %657, %672 : vector<1x128xf32>
    %c40_153 = arith.constant 40 : index
    %674 = memref.load %arg3[%c40_153] : memref<96xf32, #tpu.memory_space<smem>>
    %675 = vector.broadcast %674 : f32 to vector<1x128xf32>
    %676 = arith.mulf %675, %650 : vector<1x128xf32>
    %677 = arith.addf %661, %676 : vector<1x128xf32>
    %c64_154 = arith.constant 64 : index
    %678 = memref.load %arg3[%c64_154] : memref<96xf32, #tpu.memory_space<smem>>
    %679 = vector.broadcast %678 : f32 to vector<1x128xf32>
    %680 = arith.mulf %679, %650 : vector<1x128xf32>
    %681 = arith.addf %665, %680 : vector<1x128xf32>
    %c88 = arith.constant 88 : index
    %682 = memref.load %arg3[%c88] : memref<96xf32, #tpu.memory_space<smem>>
    %683 = vector.broadcast %682 : f32 to vector<1x128xf32>
    %684 = arith.mulf %683, %650 : vector<1x128xf32>
    %685 = arith.addf %669, %684 : vector<1x128xf32>
    %c127_i32_155 = arith.constant 127 : i32
    %686 = tpu.dynamic_rotate %650 by %c127_i32_155 dim 1 : vector<1x128xf32>, i32 -> vector<1x128xf32>
    %cst_156 = arith.constant 0.000000e+00 : f32
    %687 = vector.broadcast %cst_156 : f32 to vector<1x128xf32>
    %688 = arith.select %25, %686, %687 : vector<1x128xi1>, vector<1x128xf32>
    %c17_157 = arith.constant 17 : index
    %689 = memref.load %arg3[%c17_157] : memref<96xf32, #tpu.memory_space<smem>>
    %690 = vector.broadcast %689 : f32 to vector<1x128xf32>
    %691 = arith.mulf %690, %688 : vector<1x128xf32>
    %692 = arith.addf %673, %691 : vector<1x128xf32>
    %c41_158 = arith.constant 41 : index
    %693 = memref.load %arg3[%c41_158] : memref<96xf32, #tpu.memory_space<smem>>
    %694 = vector.broadcast %693 : f32 to vector<1x128xf32>
    %695 = arith.mulf %694, %688 : vector<1x128xf32>
    %696 = arith.addf %677, %695 : vector<1x128xf32>
    %c65_159 = arith.constant 65 : index
    %697 = memref.load %arg3[%c65_159] : memref<96xf32, #tpu.memory_space<smem>>
    %698 = vector.broadcast %697 : f32 to vector<1x128xf32>
    %699 = arith.mulf %698, %688 : vector<1x128xf32>
    %700 = arith.addf %681, %699 : vector<1x128xf32>
    %c89 = arith.constant 89 : index
    %701 = memref.load %arg3[%c89] : memref<96xf32, #tpu.memory_space<smem>>
    %702 = vector.broadcast %701 : f32 to vector<1x128xf32>
    %703 = arith.mulf %702, %688 : vector<1x128xf32>
    %704 = arith.addf %685, %703 : vector<1x128xf32>
    %cst_160 = arith.constant 0.000000e+00 : f32
    %705 = vector.broadcast %cst_160 : f32 to vector<1x128xf32>
    %c72_161 = arith.constant 72 : index
    %706 = memref.load %arg2[%c72_161] : memref<96xf32, #tpu.memory_space<smem>>
    %707 = vector.broadcast %706 : f32 to vector<1x128xf32>
    %708 = arith.mulf %707, %39 : vector<1x128xf32>
    %709 = arith.addf %705, %708 : vector<1x128xf32>
    %c73_162 = arith.constant 73 : index
    %710 = memref.load %arg2[%c73_162] : memref<96xf32, #tpu.memory_space<smem>>
    %711 = vector.broadcast %710 : f32 to vector<1x128xf32>
    %712 = arith.mulf %711, %41 : vector<1x128xf32>
    %713 = arith.addf %709, %712 : vector<1x128xf32>
    %c74_163 = arith.constant 74 : index
    %714 = memref.load %arg2[%c74_163] : memref<96xf32, #tpu.memory_space<smem>>
    %715 = vector.broadcast %714 : f32 to vector<1x128xf32>
    %716 = arith.mulf %715, %46 : vector<1x128xf32>
    %717 = arith.addf %713, %716 : vector<1x128xf32>
    %c75_164 = arith.constant 75 : index
    %718 = memref.load %arg2[%c75_164] : memref<96xf32, #tpu.memory_space<smem>>
    %719 = vector.broadcast %718 : f32 to vector<1x128xf32>
    %720 = arith.mulf %719, %51 : vector<1x128xf32>
    %721 = arith.addf %717, %720 : vector<1x128xf32>
    %c76_165 = arith.constant 76 : index
    %722 = memref.load %arg2[%c76_165] : memref<96xf32, #tpu.memory_space<smem>>
    %723 = vector.broadcast %722 : f32 to vector<1x128xf32>
    %724 = arith.mulf %723, %53 : vector<1x128xf32>
    %725 = arith.addf %721, %724 : vector<1x128xf32>
    %c77_166 = arith.constant 77 : index
    %726 = memref.load %arg2[%c77_166] : memref<96xf32, #tpu.memory_space<smem>>
    %727 = vector.broadcast %726 : f32 to vector<1x128xf32>
    %728 = arith.mulf %727, %58 : vector<1x128xf32>
    %729 = arith.addf %725, %728 : vector<1x128xf32>
    %c78_167 = arith.constant 78 : index
    %730 = memref.load %arg2[%c78_167] : memref<96xf32, #tpu.memory_space<smem>>
    %731 = vector.broadcast %730 : f32 to vector<1x128xf32>
    %732 = arith.mulf %731, %63 : vector<1x128xf32>
    %733 = arith.addf %729, %732 : vector<1x128xf32>
    %c79_168 = arith.constant 79 : index
    %734 = memref.load %arg2[%c79_168] : memref<96xf32, #tpu.memory_space<smem>>
    %735 = vector.broadcast %734 : f32 to vector<1x128xf32>
    %736 = arith.mulf %735, %65 : vector<1x128xf32>
    %737 = arith.addf %733, %736 : vector<1x128xf32>
    %c80_169 = arith.constant 80 : index
    %738 = memref.load %arg2[%c80_169] : memref<96xf32, #tpu.memory_space<smem>>
    %739 = vector.broadcast %738 : f32 to vector<1x128xf32>
    %740 = arith.mulf %739, %70 : vector<1x128xf32>
    %741 = arith.addf %737, %740 : vector<1x128xf32>
    %c81_170 = arith.constant 81 : index
    %742 = memref.load %arg2[%c81_170] : memref<96xf32, #tpu.memory_space<smem>>
    %743 = vector.broadcast %742 : f32 to vector<1x128xf32>
    %744 = arith.mulf %743, %75 : vector<1x128xf32>
    %745 = arith.addf %741, %744 : vector<1x128xf32>
    %c82_171 = arith.constant 82 : index
    %746 = memref.load %arg2[%c82_171] : memref<96xf32, #tpu.memory_space<smem>>
    %747 = vector.broadcast %746 : f32 to vector<1x128xf32>
    %748 = arith.mulf %747, %77 : vector<1x128xf32>
    %749 = arith.addf %745, %748 : vector<1x128xf32>
    %c83_172 = arith.constant 83 : index
    %750 = memref.load %arg2[%c83_172] : memref<96xf32, #tpu.memory_space<smem>>
    %751 = vector.broadcast %750 : f32 to vector<1x128xf32>
    %752 = arith.mulf %751, %82 : vector<1x128xf32>
    %753 = arith.addf %749, %752 : vector<1x128xf32>
    %c1_i32_173 = arith.constant 1 : i32
    %754 = tpu.dynamic_rotate %753 by %c1_i32_173 dim 1 : vector<1x128xf32>, i32 -> vector<1x128xf32>
    %cst_174 = arith.constant 0.000000e+00 : f32
    %755 = vector.broadcast %cst_174 : f32 to vector<1x128xf32>
    %756 = arith.select %34, %754, %755 : vector<1x128xi1>, vector<1x128xf32>
    %c18_175 = arith.constant 18 : index
    %757 = memref.load %arg3[%c18_175] : memref<96xf32, #tpu.memory_space<smem>>
    %758 = vector.broadcast %757 : f32 to vector<1x128xf32>
    %759 = arith.mulf %758, %756 : vector<1x128xf32>
    %760 = arith.addf %692, %759 : vector<1x128xf32>
    %c42_176 = arith.constant 42 : index
    %761 = memref.load %arg3[%c42_176] : memref<96xf32, #tpu.memory_space<smem>>
    %762 = vector.broadcast %761 : f32 to vector<1x128xf32>
    %763 = arith.mulf %762, %756 : vector<1x128xf32>
    %764 = arith.addf %696, %763 : vector<1x128xf32>
    %c66_177 = arith.constant 66 : index
    %765 = memref.load %arg3[%c66_177] : memref<96xf32, #tpu.memory_space<smem>>
    %766 = vector.broadcast %765 : f32 to vector<1x128xf32>
    %767 = arith.mulf %766, %756 : vector<1x128xf32>
    %768 = arith.addf %700, %767 : vector<1x128xf32>
    %c90 = arith.constant 90 : index
    %769 = memref.load %arg3[%c90] : memref<96xf32, #tpu.memory_space<smem>>
    %770 = vector.broadcast %769 : f32 to vector<1x128xf32>
    %771 = arith.mulf %770, %756 : vector<1x128xf32>
    %772 = arith.addf %704, %771 : vector<1x128xf32>
    %c19_178 = arith.constant 19 : index
    %773 = memref.load %arg3[%c19_178] : memref<96xf32, #tpu.memory_space<smem>>
    %774 = vector.broadcast %773 : f32 to vector<1x128xf32>
    %775 = arith.mulf %774, %753 : vector<1x128xf32>
    %776 = arith.addf %760, %775 : vector<1x128xf32>
    %c43_179 = arith.constant 43 : index
    %777 = memref.load %arg3[%c43_179] : memref<96xf32, #tpu.memory_space<smem>>
    %778 = vector.broadcast %777 : f32 to vector<1x128xf32>
    %779 = arith.mulf %778, %753 : vector<1x128xf32>
    %780 = arith.addf %764, %779 : vector<1x128xf32>
    %c67_180 = arith.constant 67 : index
    %781 = memref.load %arg3[%c67_180] : memref<96xf32, #tpu.memory_space<smem>>
    %782 = vector.broadcast %781 : f32 to vector<1x128xf32>
    %783 = arith.mulf %782, %753 : vector<1x128xf32>
    %784 = arith.addf %768, %783 : vector<1x128xf32>
    %c91 = arith.constant 91 : index
    %785 = memref.load %arg3[%c91] : memref<96xf32, #tpu.memory_space<smem>>
    %786 = vector.broadcast %785 : f32 to vector<1x128xf32>
    %787 = arith.mulf %786, %753 : vector<1x128xf32>
    %788 = arith.addf %772, %787 : vector<1x128xf32>
    %c127_i32_181 = arith.constant 127 : i32
    %789 = tpu.dynamic_rotate %753 by %c127_i32_181 dim 1 : vector<1x128xf32>, i32 -> vector<1x128xf32>
    %cst_182 = arith.constant 0.000000e+00 : f32
    %790 = vector.broadcast %cst_182 : f32 to vector<1x128xf32>
    %791 = arith.select %25, %789, %790 : vector<1x128xi1>, vector<1x128xf32>
    %c20_183 = arith.constant 20 : index
    %792 = memref.load %arg3[%c20_183] : memref<96xf32, #tpu.memory_space<smem>>
    %793 = vector.broadcast %792 : f32 to vector<1x128xf32>
    %794 = arith.mulf %793, %791 : vector<1x128xf32>
    %795 = arith.addf %776, %794 : vector<1x128xf32>
    %c44_184 = arith.constant 44 : index
    %796 = memref.load %arg3[%c44_184] : memref<96xf32, #tpu.memory_space<smem>>
    %797 = vector.broadcast %796 : f32 to vector<1x128xf32>
    %798 = arith.mulf %797, %791 : vector<1x128xf32>
    %799 = arith.addf %780, %798 : vector<1x128xf32>
    %c68_185 = arith.constant 68 : index
    %800 = memref.load %arg3[%c68_185] : memref<96xf32, #tpu.memory_space<smem>>
    %801 = vector.broadcast %800 : f32 to vector<1x128xf32>
    %802 = arith.mulf %801, %791 : vector<1x128xf32>
    %803 = arith.addf %784, %802 : vector<1x128xf32>
    %c92 = arith.constant 92 : index
    %804 = memref.load %arg3[%c92] : memref<96xf32, #tpu.memory_space<smem>>
    %805 = vector.broadcast %804 : f32 to vector<1x128xf32>
    %806 = arith.mulf %805, %791 : vector<1x128xf32>
    %807 = arith.addf %788, %806 : vector<1x128xf32>
    %cst_186 = arith.constant 0.000000e+00 : f32
    %808 = vector.broadcast %cst_186 : f32 to vector<1x128xf32>
    %c84_187 = arith.constant 84 : index
    %809 = memref.load %arg2[%c84_187] : memref<96xf32, #tpu.memory_space<smem>>
    %810 = vector.broadcast %809 : f32 to vector<1x128xf32>
    %811 = arith.mulf %810, %39 : vector<1x128xf32>
    %812 = arith.addf %808, %811 : vector<1x128xf32>
    %c85_188 = arith.constant 85 : index
    %813 = memref.load %arg2[%c85_188] : memref<96xf32, #tpu.memory_space<smem>>
    %814 = vector.broadcast %813 : f32 to vector<1x128xf32>
    %815 = arith.mulf %814, %41 : vector<1x128xf32>
    %816 = arith.addf %812, %815 : vector<1x128xf32>
    %c86_189 = arith.constant 86 : index
    %817 = memref.load %arg2[%c86_189] : memref<96xf32, #tpu.memory_space<smem>>
    %818 = vector.broadcast %817 : f32 to vector<1x128xf32>
    %819 = arith.mulf %818, %46 : vector<1x128xf32>
    %820 = arith.addf %816, %819 : vector<1x128xf32>
    %c87_190 = arith.constant 87 : index
    %821 = memref.load %arg2[%c87_190] : memref<96xf32, #tpu.memory_space<smem>>
    %822 = vector.broadcast %821 : f32 to vector<1x128xf32>
    %823 = arith.mulf %822, %51 : vector<1x128xf32>
    %824 = arith.addf %820, %823 : vector<1x128xf32>
    %c88_191 = arith.constant 88 : index
    %825 = memref.load %arg2[%c88_191] : memref<96xf32, #tpu.memory_space<smem>>
    %826 = vector.broadcast %825 : f32 to vector<1x128xf32>
    %827 = arith.mulf %826, %53 : vector<1x128xf32>
    %828 = arith.addf %824, %827 : vector<1x128xf32>
    %c89_192 = arith.constant 89 : index
    %829 = memref.load %arg2[%c89_192] : memref<96xf32, #tpu.memory_space<smem>>
    %830 = vector.broadcast %829 : f32 to vector<1x128xf32>
    %831 = arith.mulf %830, %58 : vector<1x128xf32>
    %832 = arith.addf %828, %831 : vector<1x128xf32>
    %c90_193 = arith.constant 90 : index
    %833 = memref.load %arg2[%c90_193] : memref<96xf32, #tpu.memory_space<smem>>
    %834 = vector.broadcast %833 : f32 to vector<1x128xf32>
    %835 = arith.mulf %834, %63 : vector<1x128xf32>
    %836 = arith.addf %832, %835 : vector<1x128xf32>
    %c91_194 = arith.constant 91 : index
    %837 = memref.load %arg2[%c91_194] : memref<96xf32, #tpu.memory_space<smem>>
    %838 = vector.broadcast %837 : f32 to vector<1x128xf32>
    %839 = arith.mulf %838, %65 : vector<1x128xf32>
    %840 = arith.addf %836, %839 : vector<1x128xf32>
    %c92_195 = arith.constant 92 : index
    %841 = memref.load %arg2[%c92_195] : memref<96xf32, #tpu.memory_space<smem>>
    %842 = vector.broadcast %841 : f32 to vector<1x128xf32>
    %843 = arith.mulf %842, %70 : vector<1x128xf32>
    %844 = arith.addf %840, %843 : vector<1x128xf32>
    %c93 = arith.constant 93 : index
    %845 = memref.load %arg2[%c93] : memref<96xf32, #tpu.memory_space<smem>>
    %846 = vector.broadcast %845 : f32 to vector<1x128xf32>
    %847 = arith.mulf %846, %75 : vector<1x128xf32>
    %848 = arith.addf %844, %847 : vector<1x128xf32>
    %c94 = arith.constant 94 : index
    %849 = memref.load %arg2[%c94] : memref<96xf32, #tpu.memory_space<smem>>
    %850 = vector.broadcast %849 : f32 to vector<1x128xf32>
    %851 = arith.mulf %850, %77 : vector<1x128xf32>
    %852 = arith.addf %848, %851 : vector<1x128xf32>
    %c95 = arith.constant 95 : index
    %853 = memref.load %arg2[%c95] : memref<96xf32, #tpu.memory_space<smem>>
    %854 = vector.broadcast %853 : f32 to vector<1x128xf32>
    %855 = arith.mulf %854, %82 : vector<1x128xf32>
    %856 = arith.addf %852, %855 : vector<1x128xf32>
    %c1_i32_196 = arith.constant 1 : i32
    %857 = tpu.dynamic_rotate %856 by %c1_i32_196 dim 1 : vector<1x128xf32>, i32 -> vector<1x128xf32>
    %cst_197 = arith.constant 0.000000e+00 : f32
    %858 = vector.broadcast %cst_197 : f32 to vector<1x128xf32>
    %859 = arith.select %34, %857, %858 : vector<1x128xi1>, vector<1x128xf32>
    %c21_198 = arith.constant 21 : index
    %860 = memref.load %arg3[%c21_198] : memref<96xf32, #tpu.memory_space<smem>>
    %861 = vector.broadcast %860 : f32 to vector<1x128xf32>
    %862 = arith.mulf %861, %859 : vector<1x128xf32>
    %863 = arith.addf %795, %862 : vector<1x128xf32>
    %c45_199 = arith.constant 45 : index
    %864 = memref.load %arg3[%c45_199] : memref<96xf32, #tpu.memory_space<smem>>
    %865 = vector.broadcast %864 : f32 to vector<1x128xf32>
    %866 = arith.mulf %865, %859 : vector<1x128xf32>
    %867 = arith.addf %799, %866 : vector<1x128xf32>
    %c69_200 = arith.constant 69 : index
    %868 = memref.load %arg3[%c69_200] : memref<96xf32, #tpu.memory_space<smem>>
    %869 = vector.broadcast %868 : f32 to vector<1x128xf32>
    %870 = arith.mulf %869, %859 : vector<1x128xf32>
    %871 = arith.addf %803, %870 : vector<1x128xf32>
    %c93_201 = arith.constant 93 : index
    %872 = memref.load %arg3[%c93_201] : memref<96xf32, #tpu.memory_space<smem>>
    %873 = vector.broadcast %872 : f32 to vector<1x128xf32>
    %874 = arith.mulf %873, %859 : vector<1x128xf32>
    %875 = arith.addf %807, %874 : vector<1x128xf32>
    %c22_202 = arith.constant 22 : index
    %876 = memref.load %arg3[%c22_202] : memref<96xf32, #tpu.memory_space<smem>>
    %877 = vector.broadcast %876 : f32 to vector<1x128xf32>
    %878 = arith.mulf %877, %856 : vector<1x128xf32>
    %879 = arith.addf %863, %878 : vector<1x128xf32>
    %c46_203 = arith.constant 46 : index
    %880 = memref.load %arg3[%c46_203] : memref<96xf32, #tpu.memory_space<smem>>
    %881 = vector.broadcast %880 : f32 to vector<1x128xf32>
    %882 = arith.mulf %881, %856 : vector<1x128xf32>
    %883 = arith.addf %867, %882 : vector<1x128xf32>
    %c70_204 = arith.constant 70 : index
    %884 = memref.load %arg3[%c70_204] : memref<96xf32, #tpu.memory_space<smem>>
    %885 = vector.broadcast %884 : f32 to vector<1x128xf32>
    %886 = arith.mulf %885, %856 : vector<1x128xf32>
    %887 = arith.addf %871, %886 : vector<1x128xf32>
    %c94_205 = arith.constant 94 : index
    %888 = memref.load %arg3[%c94_205] : memref<96xf32, #tpu.memory_space<smem>>
    %889 = vector.broadcast %888 : f32 to vector<1x128xf32>
    %890 = arith.mulf %889, %856 : vector<1x128xf32>
    %891 = arith.addf %875, %890 : vector<1x128xf32>
    %c127_i32_206 = arith.constant 127 : i32
    %892 = tpu.dynamic_rotate %856 by %c127_i32_206 dim 1 : vector<1x128xf32>, i32 -> vector<1x128xf32>
    %cst_207 = arith.constant 0.000000e+00 : f32
    %893 = vector.broadcast %cst_207 : f32 to vector<1x128xf32>
    %894 = arith.select %25, %892, %893 : vector<1x128xi1>, vector<1x128xf32>
    %c23_208 = arith.constant 23 : index
    %895 = memref.load %arg3[%c23_208] : memref<96xf32, #tpu.memory_space<smem>>
    %896 = vector.broadcast %895 : f32 to vector<1x128xf32>
    %897 = arith.mulf %896, %894 : vector<1x128xf32>
    %898 = arith.addf %879, %897 : vector<1x128xf32>
    %c47_209 = arith.constant 47 : index
    %899 = memref.load %arg3[%c47_209] : memref<96xf32, #tpu.memory_space<smem>>
    %900 = vector.broadcast %899 : f32 to vector<1x128xf32>
    %901 = arith.mulf %900, %894 : vector<1x128xf32>
    %902 = arith.addf %883, %901 : vector<1x128xf32>
    %c71_210 = arith.constant 71 : index
    %903 = memref.load %arg3[%c71_210] : memref<96xf32, #tpu.memory_space<smem>>
    %904 = vector.broadcast %903 : f32 to vector<1x128xf32>
    %905 = arith.mulf %904, %894 : vector<1x128xf32>
    %906 = arith.addf %887, %905 : vector<1x128xf32>
    %c95_211 = arith.constant 95 : index
    %907 = memref.load %arg3[%c95_211] : memref<96xf32, #tpu.memory_space<smem>>
    %908 = vector.broadcast %907 : f32 to vector<1x128xf32>
    %909 = arith.mulf %908, %894 : vector<1x128xf32>
    %910 = arith.addf %891, %909 : vector<1x128xf32>
    %c0_212 = arith.constant 0 : index
    %c0_213 = arith.constant 0 : index
    %c0_214 = arith.constant 0 : index
    %c0_215 = arith.constant 0 : index
    %911 = vector.load %arg4[%c0_212, %c0_213, %c0_214, %c0_215] : memref<1x4x1x128xf32, #tpu.memory_space<vmem>>, vector<1x1x1x128xf32>
    %912 = vector.shape_cast %911 : vector<1x1x1x128xf32> to vector<1x128xf32>
    %913 = vector.shape_cast %898 : vector<1x128xf32> to vector<1x1x1x128xf32>
    tpu.vector_store %arg4[%c0_212, %c0_213, %c0_214, %c0_215], %913 {strides = array<i32>} : memref<1x4x1x128xf32, #tpu.memory_space<vmem>>, vector<1x1x1x128xf32>,
    %c0_216 = arith.constant 0 : index
    %c1_217 = arith.constant 1 : index
    %c0_218 = arith.constant 0 : index
    %c0_219 = arith.constant 0 : index
    %914 = vector.load %arg4[%c0_216, %c1_217, %c0_218, %c0_219] : memref<1x4x1x128xf32, #tpu.memory_space<vmem>>, vector<1x1x1x128xf32>
    %915 = vector.shape_cast %914 : vector<1x1x1x128xf32> to vector<1x128xf32>
    %916 = vector.shape_cast %902 : vector<1x128xf32> to vector<1x1x1x128xf32>
    tpu.vector_store %arg4[%c0_216, %c1_217, %c0_218, %c0_219], %916 {strides = array<i32>} : memref<1x4x1x128xf32, #tpu.memory_space<vmem>>, vector<1x1x1x128xf32>,
    %c0_220 = arith.constant 0 : index
    %c2_221 = arith.constant 2 : index
    %c0_222 = arith.constant 0 : index
    %c0_223 = arith.constant 0 : index
    %917 = vector.load %arg4[%c0_220, %c2_221, %c0_222, %c0_223] : memref<1x4x1x128xf32, #tpu.memory_space<vmem>>, vector<1x1x1x128xf32>
    %918 = vector.shape_cast %917 : vector<1x1x1x128xf32> to vector<1x128xf32>
    %919 = vector.shape_cast %906 : vector<1x128xf32> to vector<1x1x1x128xf32>
    tpu.vector_store %arg4[%c0_220, %c2_221, %c0_222, %c0_223], %919 {strides = array<i32>} : memref<1x4x1x128xf32, #tpu.memory_space<vmem>>, vector<1x1x1x128xf32>,
    %c0_224 = arith.constant 0 : index
    %c3_225 = arith.constant 3 : index
    %c0_226 = arith.constant 0 : index
    %c0_227 = arith.constant 0 : index
    %920 = vector.load %arg4[%c0_224, %c3_225, %c0_226, %c0_227] : memref<1x4x1x128xf32, #tpu.memory_space<vmem>>, vector<1x1x1x128xf32>
    %921 = vector.shape_cast %920 : vector<1x1x1x128xf32> to vector<1x128xf32>
    %922 = vector.shape_cast %910 : vector<1x128xf32> to vector<1x1x1x128xf32>
    tpu.vector_store %arg4[%c0_224, %c3_225, %c0_226, %c0_227], %922 {strides = array<i32>} : memref<1x4x1x128xf32, #tpu.memory_space<vmem>>, vector<1x1x1x128xf32>,
    return
  }
  func.func @transform_0(%arg0: i32) -> (i32, i32, i32, i32) {
    %c0_i32 = arith.constant 0 : i32
    %c0_i32_0 = arith.constant 0 : i32
    %c0_i32_1 = arith.constant 0 : i32
    %c0_i32_2 = arith.constant 0 : i32
    return %arg0, %c0_i32, %c0_i32_0, %c0_i32_1 : i32, i32, i32, i32
  }
  func.func @transform_1(%arg0: i32) -> i32 {
    %c0_i32 = arith.constant 0 : i32
    %c0_i32_0 = arith.constant 0 : i32
    return %c0_i32 : i32
  }
  func.func @transform_2(%arg0: i32) -> i32 {
    %c0_i32 = arith.constant 0 : i32
    %c0_i32_0 = arith.constant 0 : i32
    return %c0_i32 : i32
  }
  func.func @transform_3(%arg0: i32) -> (i32, i32, i32, i32) {
    %c0_i32 = arith.constant 0 : i32
    %c0_i32_0 = arith.constant 0 : i32
    %c0_i32_1 = arith.constant 0 : i32
    %c0_i32_2 = arith.constant 0 : i32
    return %arg0, %c0_i32, %c0_i32_0, %c0_i32_1 : i32, i32, i32, i32
  }
}

</mosaic_0001>

<bundles_post_ra>
// kernel: fast_params_conv1d.1
= control target key start
LH: loop header
LB: loop body
LE: loop exit
PB: predicated region body
PF: predicated region fallthrough
CT: control target
= control target key end

     0   :  { %s2342_s0 = inlined_call_operand.vmem [shape: f32[1,4,1,128], index: 0, kind: input, shape index: {}]   ;;  %s2343_s1 = inlined_call_operand.vmem [shape: f32[96], index: 1, kind: input, shape index: {}]   ;;  %s2344_s2 = inlined_call_operand.vmem [shape: f32[96], index: 2, kind: input, shape index: {}]   ;;  %s2345_s3 = inlined_call_operand.vmem [shape: f32[1,4,1,128], index: 3, kind: output, shape index: {}]  }
   0x1   :  { %2384 = sst [smem:[#allocation33_spill]] %s2345_s3 }
   0x2   :  { %8 = vsyncpa [#allocation3], 0  ;;  %s17_s14 = sshll.u32 %s2343_s1, 4  ;;  %s18_s14 = int_to_ptr.vmem [resolvable:$true] %s17_s14 }
   0x3   :  { %9 = vsyncpa [#allocation5], 0  ;;  %s26_s17 = sshll.u32 %s2344_s2, 4  ;;  %s1149_s18 = smov [#allocation2]   ;;  %s27_s17 = int_to_ptr.vmem [resolvable:$true] %s26_s17 }
   0x4   :  { %20 = dma.vmem_to_smem %s18_s14, 16, %s1149_s18, [#allocation3]  }
   0x5   :  { %s1150_s19 = smov [#allocation4]  }
   0x6   :  { %29 = dma.vmem_to_smem %s27_s17, 16, %s1150_s19, [#allocation5]  }
   0x7   :  { %1145 = dma.done.wait [#allocation3], 16  }
   0x8   :  { %1146 = vsyncadd [#allocation3], 4294967280 }
   0x9   :  { %1147 = dma.done.wait [#allocation5], 16  }
   0xa   :  { %1148 = vsyncadd [#allocation5], 4294967280 }
   0xb   :  { %38 = sfence }
   0xc   :  { %v1182_v0 = vld [vmem:[%s2342_s0] sm:$0x1]  ;;  %v1187_v1 = vld [vmem:[%s2342_s0 + $0x1] sm:$0x1]  ;;  %s2348_s2 = smov 1   ;;  %s2346_s25 = smov 127   ;;  %v39_v4 = vlaneseq }
   0xd   :  { %62 = vrot.lane.b32.xlu0 %v1182_v0, %s2348_s2  ;;  %70 = vrot.lane.b32.xlu1 %v1187_v1, %s2348_s2  ;;  %v1196_v2 = vld [vmem:[%s2342_s0 + $0x2] sm:$0x1]  ;;  %v1209_v3 = vld [vmem:[%s2342_s0 + $0x3] sm:$0x1]  ;;  %s1215_s28 = sld [smem:[#allocation2]] }
   0xe   :  { %78 = vrot.lane.b32.xlu2 %v1196_v2, %s2348_s2  ;;  %s1217_s29 = sld [smem:[#allocation2 + $0x1]]  ;;  %v40_v5 = vand.u32 127, %v39_v4 }
   0xf   :  { %s1219_s30 = sld [smem:[#allocation2 + $0xc]] }
  0x10   :  { %s1221_s4 = sld [smem:[#allocation2 + $0xd]]  ;;  %v45_v6 = vand.u32 15, %v40_v5 }
  0x11   :  { %s1223_s5 = sld [smem:[#allocation2 + $0x18]] }
  0x12   :  { %s1225_s6 = sld [smem:[#allocation2 + $0x19]]  ;;  %v1295_v11 = vadd.s32 4294967295, %v45_v6  ;;  %v1354_v38 = vadd.s32 1, %v45_v6 }
  0x13   :  { %s1227_s0 = sld [smem:[#allocation2 + $0x24]]  ;;  %v93_v7 = vstv %s1215_s28 }
  0x14   :  { %s1229_s7 = sld [smem:[#allocation2 + $0x25]]  ;;  %v97_v8 = vstv %s1217_s29  ;;  %vm58_vm0 = vcmp.ge.s32.totalorder %v1295_v11, 0  ;;  %vm55_vm1 = vcmp.lt.s32.totalorder %v1354_v38, 16 }
  0x15   :  { %65 = vrot.lane.b32.xlu0 %v1182_v0, %s2346_s25  ;;  %73 = vrot.lane.b32.xlu1 %v1187_v1, %s2346_s25  ;;  %s1231_s8 = sld [smem:[#allocation2 + $0x30]]  ;;  %v195_v9 = vstv %s1219_s30  ;;  %v1319_v24 = vmul.f32 %v97_v8, %v1182_v0 }
  0x16   :  { %81 = vrot.lane.b32.xlu2 %v1196_v2, %s2346_s25  ;;  %s1233_s9 = sld [smem:[#allocation2 + $0x31]]  ;;  %v199_v10 = vstv %s1221_s4 }
  0x17   :  { %s1235_s10 = sld [smem:[#allocation2 + $0x3c]]  ;;  %v297_v12 = vstv %s1223_s5  ;;  %v1322_v25 = vmul.f32 %v199_v10, %v1182_v0 }
  0x18   :  { %s1237_s11 = sld [smem:[#allocation2 + $0x3d]]  ;;  %v301_v13 = vstv %s1225_s6 }
  0x19   :  { %2385 = sst [smem:[#allocation8_spill]] %s1227_s0  ;;  %v399_v14 = vstv %s1227_s0  ;;  %v1325_v26 = vmul.f32 %v301_v13, %v1182_v0 }
  0x1a   :  { %s1239_s12 = sld [smem:[#allocation2 + $0x48]]  ;;  %v403_v15 = vstv %s1229_s7 }
  0x1b   :  { %2386 = sst [smem:[#allocation9_spill]] %s1231_s8  ;;  %v501_v16 = vstv %s1231_s8  ;;  %v1330_v27 = vmul.f32 %v403_v15, %v1182_v0 }
  0x1c   :  { %s1241_s13 = sld [smem:[#allocation2 + $0x49]]  ;;  %v505_v17 = vstv %s1233_s9 }
  0x1d   :  { %86 = vrot.lane.b32.xlu0 %v1209_v3, %s2348_s2  ;;  %89 = vrot.lane.b32.xlu1 %v1209_v3, %s2346_s25  ;;  %2387 = sst [smem:[#allocation10_spill]] %s1235_s10  ;;  %v603_v20 = vstv %s1235_s10  ;;  %v1333_v28 = vmul.f32 %v505_v17, %v1182_v0 }
  0x1e   :  { %s1243_s14 = sld [smem:[#allocation2 + $0x54]]  ;;  %v607_v18 = vstv %s1237_s11 }
  0x1f   :  { %s1245_s15 = sld [smem:[#allocation2 + $0x55]]  ;;  %v1336_v29 = vmul.f32 %v607_v18, %v1182_v0 }
  0x20   :  { %2388 = sst [smem:[#allocation11_spill]] %s1239_s12  ;;  %v705_v21 = vstv %s1239_s12 }
  0x21   :  { %s1247_s16 = sld [smem:[#allocation2 + $0x3]] }
  0x22   :  { %s1249_s17 = sld [smem:[#allocation2 + $0xf]]  ;;  %v709_v19 = vstv %s1241_s13 }
  0x23   :  { %s1251_s18 = sld [smem:[#allocation2 + $0x1b]]  ;;  %v1339_v30 = vmul.f32 %v709_v19, %v1182_v0 }
  0x24   :  { %2389 = sst [smem:[#allocation12_spill]] %s1243_s14  ;;  %v807_v22 = vstv %s1243_s14 }
  0x25   :  { %s1253_s19 = sld [smem:[#allocation2 + $0x27]]  ;;  %v811_v23 = vstv %s1245_s15 }
  0x26   :  { %s1255_s20 = sld [smem:[#allocation2 + $0x33]]  ;;  %v1344_v31 = vmul.f32 %v811_v23, %v1182_v0 }
  0x27   :  { %s1257_s21 = sld [smem:[#allocation2 + $0x3f]]  ;;  %v105_v32 = vstv %s1247_s16 }
  0x28   :  { %2390 = sst [smem:[#allocation13_spill]] %s1249_s17  ;;  %v207_v33 = vstv %s1249_s17 }
  0x29   :  { %2391 = sst [smem:[#allocation14_spill]] %s1251_s18  ;;  %v309_v34 = vstv %s1251_s18 }
  0x2a   :  { %s1259_s1 = sld [smem:[#allocation2 + $0x4b]] }
  0x2b   :  { %2392 = sst [smem:[#allocation15_spill]] %s1253_s19  ;;  %v411_v35 = vstv %s1253_s19 }
  0x2c   :  { %s1261_s22 = sld [smem:[#allocation2 + $0x57]]  ;;  %v513_v36 = vstv %s1255_s20 }
  0x2d   :  { %2393 = sst [smem:[#allocation16_spill]] %s1257_s21  ;;  %v615_v37 = vstv %s1257_s21 }
  0x2e   :  { %s1263_s23 = sld [smem:[#allocation2 + $0x2]] }
  0x2f   :  { %s1265_s24 = sld [smem:[#allocation2 + $0xe]] }
  0x30   :  { %s1267_s26 = sld [smem:[#allocation2 + $0x1a]]  ;;  %v717_v40 = vstv %s1259_s1 }
  0x31   :  { %s1269_s27 = sld [smem:[#allocation2 + $0x26]] }
  0x32   :  { %s1271_s25 = sld [smem:[#allocation2 + $0x32]]  ;;  %v819_v41 = vstv %s1261_s22 }
  0x33   :  { %s1273_s2 = sld [smem:[#allocation2 + $0x3e]] }
  0x34   :  { %2394 = sst [smem:[#allocation17_spill]] %s1263_s23 }
  0x35   :  { %2395 = sst [smem:[#allocation18_spill]] %s1265_s24 }
  0x36   :  { %2396 = sst [smem:[#allocation19_spill]] %s1267_s26 }
  0x37   :  { %2397 = sst [smem:[#allocation20_spill]] %s1269_s27 }
  0x38   :  { %2398 = sst [smem:[#allocation21_spill]] %s1271_s25 }
  0x39   :  { %2399 = sst [smem:[#allocation22_spill]] %s1273_s2 }
  0x3a   :  { %s1275_s3 = sld [smem:[#allocation2 + $0x4a]] }
  0x3b   :  { %s1277_s23 = sld [smem:[#allocation2 + $0x56]] }
  0x3c   :  { %s1279_s24 = sld [smem:[#allocation2 + $0x6]] }
  0x3d   :  { %s1281_s26 = sld [smem:[#allocation2 + $0x12]] }
  0x3e   :  { %s1283_s27 = sld [smem:[#allocation2 + $0x1e]] }
  0x3f   :  { %s1285_s25 = sld [smem:[#allocation2 + $0x2a]] }
  0x40   :  { %2400 = sst [smem:[#allocation23_spill]] %s1275_s3 }
  0x41   :  { %s1287_s2 = sld [smem:[#allocation2 + $0x36]]  ;;  %v815_v51 = vstv %s1277_s23 }
  0x42   :  { %s1290_s3 = sld [smem:[#allocation2 + $0x42]]  ;;  %v117_v52 = vstv %s1279_s24 }
  0x43   :  { %s1309_s29 = sld [smem:[#allocation2 + $0x5]]  ;;  %v219_v54 = vstv %s1281_s26 }
  0x44   :  { %2401 = sst [smem:[#allocation24_spill]] %s1283_s27 }
  0x45   :  { %s1297_s27 = sld [smem:[#allocation2 + $0x5a]]  ;;  %v423_v56 = vstv %s1285_s25 }
  0x46   :  { %s1315_s4 = sld [smem:[#allocation2 + $0x10]] }
  0x47   :  { %2402 = sst [smem:[#allocation25_spill]] %s1287_s2 }
  0x48   :  { %s1303_s2 = sld [smem:[#allocation2 + $0x4]]  ;;  %v627_v59 = vstv %s1290_s3 }
  0x49   :  { %s1327_s6 = sld [smem:[#allocation2 + $0x11]]  ;;  %v113_v63 = vstv %s1309_s29 }
  0x4a   :  { %s2403_s7 = sld [smem:[#allocation17_spill]] }
  0x4b   :  { %s2404_s9 = sld [smem:[#allocation18_spill]] }
  0x4c   :  { %s1341_s11 = sld [smem:[#allocation2 + $0x1c]]  ;;  %v211_v0 = vstv %s1315_s4 }
  0x4d   :  { %s2405_s13 = sld [smem:[#allocation19_spill]] }
  0x4e   :  { %s2406_s15 = sld [smem:[#allocation20_spill]]  ;;  %v109_v62 = vstv %s1303_s2 }
  0x4f   :  { %s2407_s14 = sld [smem:[#allocation21_spill]]  ;;  %v110_v23 = vmul.f32 %v1187_v1, %v109_v62 }
  0x50   :  { %s2408_s12 = sld [smem:[#allocation22_spill]]  ;;  %v101_v42 = vstv %s2403_s7 }
  0x51   :  { %s1349_s10 = sld [smem:[#allocation2 + $0x1d]]  ;;  %v203_v43 = vstv %s2404_s9 }
  0x52   :  { %s2409_s0 = sld [smem:[#allocation23_spill]]  ;;  %v313_v8 = vstv %s1341_s11 }
  0x53   :  { %s1356_s8 = sld [smem:[#allocation2 + $0x28]]  ;;  %v305_v44 = vstv %s2405_s13 }
  0x54   :  { %s2410_s18 = sld [smem:[#allocation24_spill]]  ;;  %v407_v45 = vstv %s2406_s15 }
  0x55   :  { %s1362_s17 = sld [smem:[#allocation2 + $0x29]]  ;;  %v509_v46 = vstv %s2407_s14  ;;  %s2422_s14 = smov 1  }
  0x56   :  { %s2411_s21 = sld [smem:[#allocation25_spill]]  ;;  %v611_v47 = vstv %s2408_s12 }
  0x57   :  { %s1368_s19 = sld [smem:[#allocation2 + $0x34]] }
  0x58   :  { %v713_v50 = vstv %s2409_s0  ;;  %s1377_s7 = sld [smem:[#allocation2 + $0x40]] }
  0x59   :  { %s1383_s9 = sld [smem:[#allocation2 + $0x35]]  ;;  %v415_v17 = vstv %s1356_s8 }
  0x5a   :  { %v321_v55 = vstv %s2410_s18  ;;  %s1398_s25 = sld [smem:[#allocation2 + $0x41]] }
  0x5b   :  { %s1410_s3 = sld [smem:[#allocation2 + $0x4c]] }
  0x5c   :  { %v525_v58 = vstv %s2411_s21  ;;  %s1422_s2 = sld [smem:[#allocation2 + $0x58]] }
  0x5d   :  { %s1432_s28 = sld [smem:[#allocation2 + $0x7]] }
  0x5e   :  { %s1440_s30 = sld [smem:[#allocation2 + $0x13]] }
  0x5f   :  { %s1451_s5 = sld [smem:[#allocation2 + $0x59]] }
  0x60   :  { %s1460_s18 = sld [smem:[#allocation2 + $0x1f]] }
  0x61   :  { %s1466_s24 = sld [smem:[#allocation2 + $0x2b]] }
  0x62   :  { %s1478_s26 = sld [smem:[#allocation2 + $0x8]] }
  0x63   :  { %s1483_s16 = sld [smem:[#allocation2 + $0x14]] }
  0x64   :  { %s1500_s11 = sld [smem:[#allocation2 + $0x37]] }
  0x65   :  { %s1513_s13 = sld [smem:[#allocation2 + $0x2c]] }
  0x66   :  { %s1533_s29 = sld [smem:[#allocation2 + $0x15]] }
  0x67   :  { %s1578_s12 = sld [smem:[#allocation2 + $0x17]] }
  0x68   :  { %v79_v39 = vpop.permute.xlu2 %78  ;;  %s1587_s8 = sld [smem:[#allocation2 + $0x16]] }
  0x69   :  { %v1375_v53 = vsel %vm58_vm0, %v79_v39, 0.0  ;;  %v1436_v39 = vmul.f32 %v1187_v1, %v313_v8  ;;  %s1611_s21 = sld [smem:[#allocation2 + $0xa]] }
  0x6a   :  { %v1393_v61 = vmul.f32 %v117_v52, %v1375_v53  ;;  %v1401_v4 = vmul.f32 %v219_v54, %v1375_v53  ;;  %v1404_v5 = vmul.f32 %v321_v55, %v1375_v53  ;;  %v1407_v6 = vmul.f32 %v423_v56, %v1375_v53  ;;  %s1624_s0 = sld [smem:[#allocation2 + $0x43]] }
  0x6b   :  { %v1419_v15 = vmul.f32 %v525_v58, %v1375_v53  ;;  %v1428_v19 = vmul.f32 %v627_v59, %v1375_v53  ;;  %v419_v52 = vstv %s1362_s17  ;;  %v1447_v55 = vmul.f32 %v1187_v1, %v415_v17  ;;  %s1637_s17 = sld [smem:[#allocation2 + $0x39]] }
  0x6c   :  { %v517_v56 = vstv %s1368_s19  ;;  %v619_v58 = vstv %s1377_s7  ;;  %s1523_s7 = sld [smem:[#allocation2 + $0x38]] }
  0x6d   :  { %s1593_s19 = sld [smem:[#allocation2 + $0x4d]] }
  0x6e   :  { %s1640_s23 = sld [smem:[#allocation2 + $0x23]] }
  0x6f   :  { %s1648_s1 = sld [smem:[#allocation2 + $0x2d]] }
  0x70   :  { %s1655_s22 = sld [smem:[#allocation2 + $0x4f]] }
  0x71   :  { %s1673_s4 = sld [smem:[#allocation2 + $0x2e]] }
  0x72   :  { %s1729_s15 = sld [smem:[#allocation2 + $0x5d]] }
  0x73   :  { %s1756_s20 = sld [smem:[#allocation2 + $0x52]] }
  0x7f   :  { %v63_v48 = vpop.permute.xlu0 %62  ;;  %v71_v49 = vpop.permute.xlu1 %70 }
  0x80   :  { %v1387_v57 = vsel %vm58_vm0, %v63_v48, 0.0  ;;  %v317_v48 = vstv %s1349_s10  ;;  %s1100_s10 = sld [smem:[#allocation2 + $0x5e]] }
  0x81   :  { %v94_v10 = vmul.f32 %v93_v7, %v1387_v57  ;;  %v196_v13 = vmul.f32 %v195_v9, %v1387_v57  ;;  %v298_v18 = vmul.f32 %v297_v12, %v1387_v57  ;;  %v212_v7 = vmul.f32 %v1187_v1, %v211_v0 }
  0x82   :  { %v215_v9 = vstv %s1327_s6  ;;  %v1444_v12 = vsel %vm58_vm0, %v71_v49, 0.0  ;;  %v521_v49 = vstv %s1383_s9  ;;  %s1496_s6 = sld [smem:[#allocation2 + $0x20]] }
  0x83   :  { %v99_v59 = vadd.f32 %v1319_v24, %v94_v10  ;;  %v201_v62 = vadd.f32 %v1322_v25, %v196_v13  ;;  %v303_v8 = vadd.f32 %v1325_v26, %v298_v18  ;;  %v106_v25 = vmul.f32 %v105_v32, %v1444_v12  ;;  %s1619_s9 = sld [smem:[#allocation2 + $0x22]] }
  0x84   :  { %v1472_v13 = vmul.f32 %v1187_v1, %v517_v56  ;;  %v1475_v26 = vmul.f32 %v1187_v1, %v619_v58  ;;  %v310_v56 = vmul.f32 %v309_v34, %v1444_v12  ;;  %v721_v58 = vstv %s1410_s3  ;;  %s1548_s3 = sld [smem:[#allocation2 + $0x9]] }
  0x87   :  { %v66_v54 = vpop.permute.xlu0 %65  ;;  %v74_v10 = vpop.permute.xlu1 %73 }
  0x88   :  { %v1457_v0 = vsel %vm55_vm1, %v66_v54, 0.0  ;;  %v502_v54 = vmul.f32 %v501_v16, %v1387_v57  ;;  %v400_v16 = vmul.f32 %v399_v14, %v1387_v57  ;;  %v1517_v14 = vmul.f32 %v1187_v1, %v721_v58 }
  0x89   :  { %v102_v17 = vmul.f32 %v101_v42, %v1457_v0  ;;  %v204_v60 = vmul.f32 %v203_v43, %v1457_v0  ;;  %v306_v24 = vmul.f32 %v305_v44, %v1457_v0  ;;  %v208_v43 = vmul.f32 %v207_v33, %v1444_v12 }
  0x8a   :  { %v1494_v42 = vsel %vm55_vm1, %v74_v10, 0.0  ;;  %v405_v58 = vadd.f32 %v1330_v27, %v400_v16  ;;  %v329_v16 = vstv %s1496_s6  ;;  %s1680_s6 = sld [smem:[#allocation2 + $0x50]] }
  0x8b   :  { %v103_v44 = vadd.f32 %v102_v17, %v99_v59  ;;  %v205_v18 = vadd.f32 %v204_v60, %v201_v62  ;;  %v307_v32 = vadd.f32 %v306_v24, %v303_v8  ;;  %v823_v59 = vstv %s1422_s2  ;;  %s1559_s2 = sld [smem:[#allocation2 + $0x4e]] }
  0x8c   :  { %v121_v62 = vstv %s1432_s28  ;;  %v510_v8 = vmul.f32 %v509_v46, %v1457_v0  ;;  %v223_v17 = vstv %s1440_s30  ;;  %v114_v10 = vmul.f32 %v113_v63, %v1494_v42  ;;  %s1570_s28 = sld [smem:[#allocation2 + $0x21]] }
  0x8d   :  { %v107_v33 = vadd.f32 %v106_v25, %v103_v44  ;;  %v209_v60 = vadd.f32 %v208_v43, %v205_v18  ;;  %v311_v34 = vadd.f32 %v310_v56, %v307_v32  ;;  %v216_v43 = vmul.f32 %v215_v9, %v1494_v42  ;;  %v82_v56 = vpop.permute.xlu2 %81  ;;  %s1802_s30 = sld [smem:[#allocation4 + $0x18]] }
  0x8e   :  { %v507_v44 = vadd.f32 %v1333_v28, %v502_v54  ;;  %v1520_v18 = vmul.f32 %v1187_v1, %v823_v59  ;;  %v827_v46 = vstv %s1451_s5  ;;  %v408_v63 = vmul.f32 %v407_v45, %v1457_v0  ;;  %s1718_s5 = sld [smem:[#allocation2 + $0x46]] }
  0x8f   :  { %v111_v24 = vadd.f32 %v110_v23, %v107_v33  ;;  %v213_v25 = vadd.f32 %v212_v7, %v209_v60  ;;  %v122_v23 = vmul.f32 %v1196_v2, %v121_v62  ;;  %v325_v7 = vstv %s1460_s18  ;;  %s1591_s18 = sld [smem:[#allocation2 + $0xb]] }
  0x90   :  { %v427_v28 = vstv %s1466_s24  ;;  %v511_v9 = vadd.f32 %v510_v8, %v507_v44  ;;  %v125_v1 = vstv %s1478_s26  ;;  %v224_v54 = vmul.f32 %v1196_v2, %v223_v17  ;;  %s1627_s24 = sld [smem:[#allocation2 + $0x44]] }
  0x91   :  { %v217_v32 = vadd.f32 %v216_v43, %v213_v25  ;;  %v115_v33 = vadd.f32 %v114_v10, %v111_v24  ;;  %v315_v45 = vadd.f32 %v1436_v39, %v311_v34  ;;  %v318_v60 = vmul.f32 %v317_v48, %v1494_v42  ;;  %s1657_s26 = sld [smem:[#allocation2 + $0x5b]] }
  0x92   :  { %v604_v59 = vmul.f32 %v603_v20, %v1387_v57  ;;  %v514_v62 = vmul.f32 %v513_v36, %v1444_v12  ;;  %v227_v8 = vstv %s1483_s16  ;;  %v326_v17 = vmul.f32 %v1196_v2, %v325_v7  ;;  %s1678_s16 = sld [smem:[#allocation2 + $0x45]] }
  0x93   :  { %v409_v27 = vadd.f32 %v408_v63, %v405_v58  ;;  %v529_v39 = vstv %s1500_s11  ;;  %v1554_v34 = vsel %vm55_vm1, %v82_v56, 0.0  ;;  %v612_v20 = vmul.f32 %v611_v47, %v1457_v0  ;;  %s1689_s11 = sld [smem:[#allocation2 + $0x3b]] }
  0x94   :  { %v515_v48 = vadd.f32 %v514_v62, %v511_v9  ;;  %v221_v36 = vadd.f32 %v1401_v4, %v217_v32  ;;  %v1563_v24 = vmul.f32 %v1196_v2, %v427_v28  ;;  %v412_v10 = vmul.f32 %v411_v35, %v1444_v12  ;;  %v87_v28 = vpop.permute.xlu0 %86 }
  0x95   :  { %v119_v25 = vadd.f32 %v1393_v61, %v115_v33  ;;  %v319_v43 = vadd.f32 %v318_v60, %v315_v45  ;;  %v431_v44 = vstv %s1513_s13  ;;  %v609_v47 = vadd.f32 %v1336_v29, %v604_v59  ;;  %s1697_s13 = sld [smem:[#allocation2 + $0x2f]] }
  0x96   :  { %v1574_v63 = vmul.f32 %v1196_v2, %v529_v39  ;;  %v533_v7 = vstv %s1523_s7  ;;  %v126_v4 = vmul.f32 %v125_v1, %v1554_v34  ;;  %v706_v35 = vmul.f32 %v705_v21, %v1387_v57  ;;  %s1707_s7 = sld [smem:[#allocation2 + $0x5c]] }
  0x97   :  { %v808_v61 = vmul.f32 %v807_v22, %v1387_v57  ;;  %v413_v9 = vadd.f32 %v412_v10, %v409_v27  ;;  %v228_v29 = vmul.f32 %v227_v8, %v1554_v34  ;;  %v613_v32 = vadd.f32 %v612_v20, %v609_v47 }
  0x98   :  { %v519_v1 = vadd.f32 %v1472_v13, %v515_v48  ;;  %v225_v56 = vadd.f32 %v224_v54, %v221_v36  ;;  %v231_v58 = vstv %s1533_s29  ;;  %v323_v21 = vadd.f32 %v1404_v5, %v319_v43  ;;  %s2423_s29 = smov 127  }
  0x99   :  { %v522_v22 = vmul.f32 %v521_v49, %v1494_v42  ;;  %v123_v57 = vadd.f32 %v122_v23, %v119_v25  ;;  %v1601_v33 = vsel %vm58_vm0, %v87_v28, 0.0  ;;  %v616_v13 = vmul.f32 %v615_v37, %v1444_v12 }
  0x9a   :  { %v714_v54 = vmul.f32 %v713_v50, %v1457_v0  ;;  %v330_v45 = vmul.f32 %v329_v16, %v1554_v34  ;;  %v129_v60 = vstv %s1548_s3  ;;  %v711_v5 = vadd.f32 %v1339_v30, %v706_v35  ;;  %s1740_s3 = sld [smem:[#allocation2 + $0x51]] }
  0x9b   :  { %v813_v49 = vadd.f32 %v1344_v31, %v808_v61  ;;  %v417_v23 = vadd.f32 %v1447_v55, %v413_v9  ;;  %v420_v59 = vmul.f32 %v419_v52, %v1494_v42  ;;  %v617_v37 = vadd.f32 %v616_v13, %v613_v32  ;;  %v90_v31 = vpop.permute.xlu1 %89 }
  0x9c   :  { %v816_v50 = vmul.f32 %v815_v51, %v1457_v0  ;;  %v229_v30 = vadd.f32 %v228_v29, %v225_v56  ;;  %v232_v62 = vmul.f32 %v231_v58, %v1601_v33  ;;  %v523_v8 = vadd.f32 %v522_v22, %v519_v1 }
  0x9d   :  { %v127_v55 = vadd.f32 %v126_v4, %v123_v57  ;;  %v327_v52 = vadd.f32 %v326_v17, %v323_v21  ;;  %v130_v27 = vmul.f32 %v129_v60, %v1601_v33  ;;  %v718_v16 = vmul.f32 %v717_v40, %v1444_v12 }
  0x9e   :  { %v820_v51 = vmul.f32 %v819_v41, %v1444_v12  ;;  %v715_v0 = vadd.f32 %v714_v54, %v711_v5  ;;  %v333_v39 = vstv %s1570_s28  ;;  %v421_v48 = vadd.f32 %v420_v59, %v417_v23  ;;  %s1077_s28 = sld [smem:[#allocation2 + $0x53]] }
  0x9f   :  { %v239_v20 = vstv %s1578_s12  ;;  %v1644_v17 = vsel %vm55_vm1, %v90_v31, 0.0  ;;  %v235_v36 = vstv %s1587_s8  ;;  %v817_v10 = vadd.f32 %v816_v50, %v813_v49  ;;  %s1800_s12 = sld [smem:[#allocation4]] }
  0xa0   :  { %v621_v40 = vadd.f32 %v1475_v26, %v617_v37  ;;  %v233_v41 = vadd.f32 %v232_v62, %v229_v30  ;;  %v137_v12 = vstv %s1591_s18  ;;  %v527_v25 = vadd.f32 %v1419_v15, %v523_v8  ;;  %s1806_s8 = sld [smem:[#allocation4 + $0x30]] }
  0xa1   :  { %v2421_v43 = vstv %s1398_s25  ;;  %v331_v4 = vadd.f32 %v330_v45, %v327_v52  ;;  %v131_v28 = vadd.f32 %v130_v27, %v127_v55  ;;  %v334_v26 = vmul.f32 %v333_v39, %v1601_v33  ;;  %s1667_s25 = sld [smem:[#allocation2 + $0x3a]] }
  0xa2   :  { %v624_v47 = vmul.f32 %v2421_v43, %v1494_v42  ;;  %v240_v35 = vmul.f32 %v239_v20, %v1644_v17  ;;  %v236_v61 = vmul.f32 %v1209_v3, %v235_v36  ;;  %v133_v9 = vstv %s1611_s21  ;;  %s1808_s18 = sld [smem:[#allocation4 + $0x48]] }
  0xa3   :  { %v425_v15 = vadd.f32 %v1407_v6, %v421_v48  ;;  %v138_v29 = vmul.f32 %v137_v12, %v1644_v17  ;;  %v134_v32 = vmul.f32 %v1209_v3, %v133_v9  ;;  %v337_v1 = vstv %s1619_s9  ;;  %s1812_s21 = sld [smem:[#allocation4 + $0x19]] }
  0xa4   :  { %v719_v56 = vadd.f32 %v718_v16, %v715_v0  ;;  %v631_v58 = vstv %s1624_s0  ;;  %v432_v21 = vmul.f32 %v431_v44, %v1554_v34  ;;  %v237_v22 = vadd.f32 %v236_v61, %v233_v41  ;;  %s1814_s9 = sld [smem:[#allocation4 + $0x31]] }
  0xa5   :  { %v821_v57 = vadd.f32 %v820_v51, %v817_v10  ;;  %v625_v6 = vadd.f32 %v624_v47, %v621_v40  ;;  %v534_v13 = vmul.f32 %v533_v7, %v1554_v34  ;;  %v135_v54 = vadd.f32 %v134_v32, %v131_v28  ;;  %s1816_s0 = sld [smem:[#allocation4 + $0x49]] }
  0xa6   :  { %v531_v45 = vadd.f32 %v1574_v63, %v527_v25  ;;  %v335_v60 = vadd.f32 %v334_v26, %v331_v4  ;;  %v1683_v44 = vadd.f32 %v240_v35, %v237_v22  ;;  %v338_v5 = vmul.f32 %v1209_v3, %v337_v1 }
  0xa7   :  { %v429_v49 = vadd.f32 %v1563_v24, %v425_v15  ;;  %v537_v23 = vstv %s1637_s17  ;;  %v341_v59 = vstv %s1640_s23  ;;  %v1691_v7 = vadd.f32 %v138_v29, %v135_v54  ;;  %s1820_s17 = sld [smem:[#allocation4 + $0x1c]] }
  0xa8   :  { %v725_v37 = vstv %s1593_s19  ;;  %v723_v50 = vadd.f32 %v1517_v14, %v719_v56  ;;  %v632_v63 = vmul.f32 %v1196_v2, %v631_v58  ;;  %v435_v30 = vstv %s1648_s1  ;;  %242 = vrot.lane.b32.xlu1 %v1683_v44, %s2422_s14  ;;  %2425 = sst [smem:[#allocation17_spill]] %s1808_s18 }
  0xa9   :  { %v629_v24 = vadd.f32 %v1428_v19, %v625_v6  ;;  %v825_v62 = vadd.f32 %v1520_v18, %v821_v57  ;;  %v828_v31 = vmul.f32 %v827_v46, %v1494_v42  ;;  %v635_v14 = vstv %s1627_s24  ;;  %175 = vrot.lane.b32.xlu0 %v1691_v7, %s2423_s29  ;;  %140 = vrot.lane.b32.xlu2 %v1691_v7, %s2422_s14  ;;  %s1810_s19 = sld [smem:[#allocation4 + $0x1]] }
  0xaa   :  { %v535_v19 = vadd.f32 %v534_v13, %v531_v45  ;;  %v538_v18 = vmul.f32 %v537_v23, %v1601_v33  ;;  %v342_v8 = vmul.f32 %v341_v59, %v1644_v17  ;;  %v339_v55 = vadd.f32 %v338_v5, %v335_v60  ;;  %s1818_s24 = sld [smem:[#allocation4 + $0x4]] }
  0xab   :  { %v726_v46 = vmul.f32 %v725_v37, %v1494_v42  ;;  %v433_v52 = vadd.f32 %v432_v21, %v429_v49  ;;  %v436_v27 = vmul.f32 %v435_v30, %v1601_v33  ;;  %v541_v16 = vstv %s1667_s25  ;;  %s1822_s23 = sld [smem:[#allocation4 + $0x34]] }
  0xac   :  { %v729_v51 = vstv %s1559_s2  ;;  %v2424_v0 = vstv %s1297_s27  ;;  %v733_v48 = vstv %s1655_s22  ;;  %v439_v20 = vstv %s1673_s4  ;;  %s1735_s27 = sld [smem:[#allocation2 + $0x47]] }
  0xad   :  { %v832_v39 = vmul.f32 %v2424_v0, %v1375_v53  ;;  %v829_v36 = vadd.f32 %v828_v31, %v825_v62  ;;  %v835_v10 = vstv %s1657_s26  ;;  %v636_v40 = vmul.f32 %v635_v14, %v1554_v34  ;;  %s1101_s2 = sld [smem:[#allocation2 + $0x5f]] }
  0xae   :  { %v639_v42 = vstv %s1678_s16  ;;  %v633_v41 = vadd.f32 %v632_v63, %v629_v24  ;;  %v539_v12 = vadd.f32 %v538_v18, %v535_v19  ;;  %v1731_v25 = vadd.f32 %v342_v8, %v339_v55  ;;  %s1824_s1 = sld [smem:[#allocation4 + $0x4c]] }
  0xaf   :  { %v542_v43 = vmul.f32 %v1209_v3, %v541_v16  ;;  %v727_v47 = vadd.f32 %v726_v46, %v723_v50  ;;  %v437_v4 = vadd.f32 %v436_v27, %v433_v52  ;;  %v545_v28 = vstv %s1689_s11  ;;  %s1826_s22 = sld [smem:[#allocation4 + $0x7]] }
  0xb0   :  { %v440_v26 = vmul.f32 %v1209_v3, %v439_v20  ;;  %v730_v35 = vmul.f32 %v729_v51, %v1375_v53  ;;  %v737_v61 = vstv %s1680_s6  ;;  %v443_v9 = vstv %s1697_s13  ;;  %379 = vrot.lane.b32.xlu1 %v1731_v25, %s2423_s29  ;;  %s1828_s26 = sld [smem:[#allocation4 + $0x1f]] }
  0xb1   :  { %v833_v15 = vadd.f32 %v832_v39, %v829_v36  ;;  %v734_v29 = vmul.f32 %v1196_v2, %v733_v48  ;;  %v836_v32 = vmul.f32 %v1196_v2, %v835_v10  ;;  %v839_v1 = vstv %s1707_s7  ;;  %344 = vrot.lane.b32.xlu0 %v1731_v25, %s2422_s14  ;;  %277 = vrot.lane.b32.xlu2 %v1683_v44, %s2423_s29  ;;  %s1830_s25 = sld [smem:[#allocation4 + $0x37]] }
  0xb2   :  { %v637_v53 = vadd.f32 %v636_v40, %v633_v41  ;;  %v640_v56 = vmul.f32 %v639_v42, %v1601_v33  ;;  %v546_v58 = vmul.f32 %v545_v28, %v1644_v17  ;;  %v543_v21 = vadd.f32 %v542_v43, %v539_v12  ;;  %s1832_s4 = sld [smem:[#allocation4 + $0x4f]] }
  0xb3   :  { %v731_v22 = vadd.f32 %v730_v35, %v727_v47  ;;  %v444_v57 = vmul.f32 %v443_v9, %v1644_v17  ;;  %v441_v2 = vadd.f32 %v440_v26, %v437_v4  ;;  %v643_v6 = vstv %s1718_s5  ;;  %s1834_s16 = sld [smem:[#allocation4 + $0xa]] }
  0xb4   :  { %v738_v13 = vmul.f32 %v737_v61, %v1554_v34  ;;  %v840_v54 = vmul.f32 %v839_v1, %v1554_v34  ;;  %v837_v45 = vadd.f32 %v836_v32, %v833_v15  ;;  %v641_v60 = vadd.f32 %v640_v56, %v637_v53  ;;  %s1836_s6 = sld [smem:[#allocation4 + $0x22]] }
  0xb5   :  { %v1760_v5 = vadd.f32 %v546_v58, %v543_v21  ;;  %v644_v49 = vmul.f32 %v1209_v3, %v643_v6  ;;  %v735_v23 = vadd.f32 %v734_v29, %v731_v22  ;;  %v843_v59 = vstv %s1729_s15  ;;  %s1838_s11 = sld [smem:[#allocation4 + $0x3a]] }
  0xb6   :  { %v647_v37 = vstv %s1735_s27  ;;  %v1765_v50 = vadd.f32 %v444_v57, %v441_v2  ;;  %v741_v63 = vstv %s1740_s3  ;;  %v841_v34 = vadd.f32 %v840_v54, %v837_v45  ;;  %s1840_s13 = sld [smem:[#allocation4 + $0x52]] }
  0xb7   :  { %v844_v30 = vmul.f32 %v843_v59, %v1601_v33  ;;  %v648_v24 = vmul.f32 %v647_v37, %v1644_v17  ;;  %v645_v62 = vadd.f32 %v644_v49, %v641_v60  ;;  %v739_v31 = vadd.f32 %v738_v13, %v735_v23  ;;  %s1844_s7 = sld [smem:[#allocation4 + $0x25]] }
  0xb8   :  { %548 = vrot.lane.b32.xlu1 %v1760_v5, %s2422_s14  ;;  %v742_v14 = vmul.f32 %v741_v63, %v1601_v33  ;;  %v847_v19 = vstv %s1100_s10  ;;  %v745_v18 = vstv %s1756_s20  ;;  %v851_v27 = vstv %s1101_s2  ;;  %s1848_s5 = sld [smem:[#allocation4 + $0x55]] }
  0xb9   :  { %481 = vrot.lane.b32.xlu0 %v1765_v50, %s2423_s29  ;;  %446 = vrot.lane.b32.xlu2 %v1765_v50, %s2422_s14  ;;  %v845_v8 = vadd.f32 %v844_v30, %v841_v34  ;;  %v1778_v55 = vadd.f32 %v648_v24, %v645_v62  ;;  %v848_v46 = vmul.f32 %v1209_v3, %v847_v19  ;;  %v749_v51 = vstv %s1077_s28  ;;  %s1850_s15 = sld [smem:[#allocation4 + $0x10]] }
  0xba   :  { %v743_v52 = vadd.f32 %v742_v14, %v739_v31  ;;  %v746_v16 = vmul.f32 %v1209_v3, %v745_v18  ;;  %v852_v33 = vmul.f32 %v851_v27, %v1644_v17  ;;  %v750_v39 = vmul.f32 %v749_v51, %v1644_v17  ;;  %s1852_s27 = sld [smem:[#allocation4 + $0x28]] }
  0xbb   :  { %v849_v0 = vadd.f32 %v848_v46, %v845_v8  ;;  %s1854_s3 = sld [smem:[#allocation4 + $0x40]]  ;;  %v160_v3 = vstv %s1810_s19  ;;  %v164_v17 = vstv %s1812_s21  ;;  %v168_v10 = vstv %s1814_s9 }
  0xbc   :  { %v747_v48 = vadd.f32 %v746_v16, %v743_v52  ;;  %s1856_s10 = sld [smem:[#allocation4 + $0x58]]  ;;  %v172_v40 = vstv %s1816_s0  ;;  %v262_v42 = vstv %s1818_s24  ;;  %v1910_v41 = vmul.f32 %v160_v3, %v1691_v7 }
  0xbd   :  { %v1790_v20 = vadd.f32 %v852_v33, %v849_v0  ;;  %2426 = sst [smem:[#allocation18_spill]] %s1844_s7  ;;  %v1913_v12 = vmul.f32 %v164_v17, %v1691_v7  ;;  %v266_v43 = vstv %s1820_s17  ;;  %v1919_v47 = vmul.f32 %v168_v10, %v1691_v7 }
  0xbe   :  { %v1792_v36 = vadd.f32 %v750_v39, %v747_v48  ;;  %2427 = sst [smem:[#allocation19_spill]] %s1848_s5  ;;  %v270_v4 = vstv %s1822_s23  ;;  %v274_v28 = vstv %s1824_s1  ;;  %v364_v26 = vstv %s1826_s22 }
  0xbf   :  { %2428 = sst [smem:[#allocation20_spill]] %s1850_s15  ;;  %v1927_v35 = vmul.f32 %v172_v40, %v1691_v7  ;;  %v1932_v61 = vmul.f32 %v262_v42, %v1683_v44  ;;  %v368_v9 = vstv %s1828_s26  ;;  %v372_v15 = vstv %s1830_s25 }
  0xc0   :  { %685 = vrot.lane.b32.xlu1 %v1778_v55, %s2423_s29  ;;  %2429 = sst [smem:[#allocation21_spill]] %s1852_s27  ;;  %v1939_v29 = vmul.f32 %v266_v43, %v1683_v44  ;;  %v376_v32 = vstv %s1832_s4  ;;  %v466_v1 = vstv %s1834_s16  ;;  %v470_v53 = vstv %s1836_s6 }
  0xc1   :  { %650 = vrot.lane.b32.xlu0 %v1778_v55, %s2422_s14  ;;  %583 = vrot.lane.b32.xlu2 %v1760_v5, %s2423_s29  ;;  %s1858_s20 = sld [smem:[#allocation4 + $0x5]]  ;;  %v1947_v56 = vmul.f32 %v270_v4, %v1683_v44  ;;  %v1950_v58 = vmul.f32 %v274_v28, %v1683_v44  ;;  %v1953_v21 = vmul.f32 %v364_v26, %v1731_v25  ;;  %v474_v22 = vstv %s1838_s11 }
  0xc2   :  { %2430 = sst [smem:[#allocation22_spill]] %s1856_s10  ;;  %v1959_v57 = vmul.f32 %v368_v9, %v1731_v25  ;;  %v1962_v2 = vmul.f32 %v372_v15, %v1731_v25  ;;  %v478_v6 = vstv %s1840_s13  ;;  %v144_v54 = vstv %s1800_s12 }
  0xc3   :  { %s1860_s2 = sld [smem:[#allocation4 + $0x1d]]  ;;  %v1970_v44 = vmul.f32 %v376_v32, %v1731_v25  ;;  %v1973_v45 = vmul.f32 %v466_v1, %v1765_v50  ;;  %v1976_v60 = vmul.f32 %v470_v53, %v1765_v50  ;;  %v148_v49 = vstv %s1802_s30 }
  0xc4   :  { %s1862_s28 = sld [smem:[#allocation4 + $0x35]]  ;;  %v152_v23 = vstv %s1806_s8  ;;  %v1984_v25 = vmul.f32 %v474_v22, %v1765_v50  ;;  %v1989_v37 = vmul.f32 %v478_v6, %v1765_v50  ;;  %v678_v14 = vstv %s1854_s3 }
  0xc5   :  { %s1864_s18 = sld [smem:[#allocation4 + $0x4d]]  ;;  %v2030_v39 = vmul.f32 %v678_v14, %v1778_v55 }
  0xc6   :  { %s1866_s7 = sld [smem:[#allocation4 + $0x13]] }
  0xc7   :  { %2431 = sst [smem:[#allocation23_spill]] %s1858_s20 }
  0xc8   :  { %854 = vrot.lane.b32.xlu1 %v1790_v20, %s2422_s14  ;;  %s1868_s5 = sld [smem:[#allocation4 + $0x2b]] }
  0xc9   :  { %787 = vrot.lane.b32.xlu0 %v1792_v36, %s2423_s29  ;;  %752 = vrot.lane.b32.xlu2 %v1792_v36, %s2422_s14  ;;  %s1842_s14 = sld [smem:[#allocation4 + $0xd]] }
  0xca   :  { %2432 = sst [smem:[#allocation24_spill]] %s1860_s2 }
  0xcb   :  { %2433 = sst [smem:[#allocation25_spill]] %s1862_s28 }
  0xcc   :  { %2434 = sst [smem:[#allocation13_spill]] %s1864_s18 }
  0xcd   :  { %2435 = sst [smem:[#allocation9_spill]] %s1866_s7 }
  0xce   :  { %2436 = sst [smem:[#allocation14_spill]] %s1868_s5 }
  0xcf   :  { %s1870_s15 = sld [smem:[#allocation4 + $0x9]]  ;;  %v568_v13 = vstv %s1842_s14 }
  0xd0   :  { %s1872_s27 = sld [smem:[#allocation4 + $0x21]]  ;;  %v1992_v63 = vmul.f32 %v568_v13, %v1760_v5 }
  0xd1   :  { %889 = vrot.lane.b32.xlu2 %v1790_v20, %s2423_s29  ;;  %s1846_s29 = sld [smem:[#allocation4 + $0x3d]] }
  0xd2   :  { %s1874_s10 = sld [smem:[#allocation4 + $0x39]] }
  0xd3   :  { %s1876_s20 = sld [smem:[#allocation4 + $0x51]] }
  0xd4   :  { %s1878_s2 = sld [smem:[#allocation4 + $0x43]] }
  0xd5   :  { %2437 = sst [smem:[#allocation8_spill]] %s1870_s15 }
  0xd6   :  { %2438 = sst [smem:[#allocation10_spill]] %s1872_s27 }
  0xd7   :  { %s1880_s28 = sld [smem:[#allocation4 + $0x5b]]  ;;  %v576_v30 = vstv %s1846_s29 }
  0xd8   :  { %2439 = sst [smem:[#allocation15_spill]] %s1874_s10  ;;  %v2014_v52 = vmul.f32 %v576_v30, %v1760_v5 }
  0xd9   :  { %2440 = sst [smem:[#allocation11_spill]] %s1876_s20 }
  0xda   :  { %2441 = sst [smem:[#allocation12_spill]] %s1878_s2 }
  0xdb   :  { %s1882_s18 = sld [smem:[#allocation4 + $0x16]] }
  0xdc   :  { %s1884_s7 = sld [smem:[#allocation4 + $0x2e]] }
  0xdd   :  { %s1886_s5 = sld [smem:[#allocation4 + $0x3]]  ;;  %v784_v27 = vstv %s1880_s28 }
  0xde   :  { %s1888_s15 = sld [smem:[#allocation4 + $0x1b]] }
  0xdf   :  { %s1890_s27 = sld [smem:[#allocation4 + $0x33]] }
  0xe0   :  { %s1892_s10 = sld [smem:[#allocation4 + $0x4b]] }
  0xe1   :  { %2442 = sst [smem:[#allocation16_spill]] %s1882_s18 }
  0xe2   :  { %2443 = sst [smem:[#allocation26_spill]] %s1884_s7 }
  0xe3   :  { %2444 = sst [smem:[#allocation27_spill]] %s1886_s5 }
  0xe4   :  { %s1894_s20 = sld [smem:[#allocation4 + $0x46]]  ;;  %v250_v13 = vstv %s1888_s15 }
  0xe5   :  { %2445 = sst [smem:[#allocation28_spill]] %s1890_s27 }
  0xe6   :  { %s1896_s2 = sld [smem:[#allocation4 + $0x5e]] }
  0xe7   :  { %s1900_s18 = sld [smem:[#allocation4 + $0x2]] }
  0xe8   :  { %s1903_s5 = sld [smem:[#allocation4 + $0x1a]] }
  0xe9   :  { %s1906_s27 = sld [smem:[#allocation4 + $0x32]] }
  0xea   :  { %2446 = sst [smem:[#allocation29_spill]] %s1894_s20 }
  0xeb   :  { %s1915_s19 = sld [smem:[#allocation4 + $0x4a]] }
  0xec   :  { %2447 = sst [smem:[#allocation30_spill]] %s1896_s2 }
  0xed   :  { %s1921_s21 = sld [smem:[#allocation4 + $0xe]]  ;;  %v179_v30 = vstv %s1900_s18 }
  0xee   :  { %s1929_s9 = sld [smem:[#allocation4 + $0x26]] }
  0xef   :  { %s1936_s0 = sld [smem:[#allocation4 + $0x3e]] }
  0xf0   :  { %s1944_s24 = sld [smem:[#allocation4 + $0x56]] }
  0xf1   :  { %s2450_s17 = sld [smem:[#allocation17_spill]]  ;;  %v191_v14 = vstv %s1915_s19 }
  0xf2   :  { %s1956_s23 = sld [smem:[#allocation4 + $0x8]] }
  0xf3   :  { %s2452_s1 = sld [smem:[#allocation18_spill]] }
  0xf4   :  { %s2453_s22 = sld [smem:[#allocation19_spill]] }
  0xf5   :  { %2448 = sst [smem:[#allocation31_spill]] %s1936_s0 }
  0xf6   :  { %2449 = sst [smem:[#allocation32_spill]] %s1944_s24 }
  0xf7   :  { %s1967_s26 = sld [smem:[#allocation4 + $0x20]]  ;;  %v156_v59 = vstv %s2450_s17 }
  0xf8   :  { %2451 = sst [smem:[#allocation17_spill]] %s1956_s23 }
  0xf9   :  { %s2455_s25 = sld [smem:[#allocation20_spill]]  ;;  %v572_v34 = vstv %s2452_s1 }
  0xfa   :  { %s2456_s4 = sld [smem:[#allocation21_spill]]  ;;  %v580_v24 = vstv %s2453_s22  ;;  %v2011_v46 = vmul.f32 %v572_v34, %v1760_v5  ;;  %v258_v34 = vstv %s1892_s10 }
  0xfb   :  { %s2457_s16 = sld [smem:[#allocation22_spill]]  ;;  %v2021_v51 = vmul.f32 %v580_v24, %v1760_v5  ;;  %v183_v24 = vstv %s1903_s5 }
  0xfc   :  { %s2458_s6 = sld [smem:[#allocation9_spill]] }
  0xfd   :  { %2454 = sst [smem:[#allocation18_spill]] %s1967_s26 }
  0xfe   :  { %s2459_s11 = sld [smem:[#allocation14_spill]] }
  0xff   :  { %s1981_s13 = sld [smem:[#allocation4 + $0x38]]  ;;  %v670_v62 = vstv %s2455_s25 }
 0x100   :  { %s2461_s14 = sld [smem:[#allocation12_spill]]  ;;  %v674_v31 = vstv %s2456_s4  ;;  %v2024_v33 = vmul.f32 %v670_v62, %v1778_v55 }
 0x101   :  { %s1986_s26 = sld [smem:[#allocation4 + $0x50]]  ;;  %v682_v19 = vstv %s2457_s16  ;;  %v2027_v0 = vmul.f32 %v674_v31, %v1778_v55  ;;  %v187_v31 = vstv %s1906_s27 }
 0x102   :  { %s2463_s23 = sld [smem:[#allocation16_spill]]  ;;  %v772_v18 = vstv %s2458_s6  ;;  %v2035_v48 = vmul.f32 %v682_v19, %v1778_v55  ;;  %v2049_v55 = vmul.f32 %v784_v27, %v1792_v36 }
 0x103   :  { %v141_v7 = vpop.permute.xlu2 %140  ;;  %s1996_s24 = sld [smem:[#allocation4 + $0x6]]  ;;  %v2038_v5 = vmul.f32 %v772_v18, %v1792_v36 }
 0x104   :  { %v776_v8 = vstv %s2459_s11  ;;  %s2018_s29 = sld [smem:[#allocation4 + $0x4e]] }
 0x105   :  { %2460 = sst [smem:[#allocation19_spill]] %s1981_s13  ;;  %v2041_v3 = vmul.f32 %v776_v8, %v1792_v36 }
 0x106   :  { %s2002_s13 = sld [smem:[#allocation4 + $0x1e]]  ;;  %v780_v50 = vstv %s2461_s14 }
 0x107   :  { %2462 = sst [smem:[#allocation20_spill]] %s1986_s26  ;;  %v2044_v17 = vmul.f32 %v780_v50, %v1792_v36  ;;  %v142_v36 = vsel %vm58_vm0, %v141_v7, 0.0 }
 0x108   :  { %s2008_s26 = sld [smem:[#allocation4 + $0x36]]  ;;  %v874_v16 = vstv %s2463_s23  ;;  %v145_v62 = vmul.f32 %v144_v54, %v142_v36  ;;  %v149_v18 = vmul.f32 %v148_v49, %v142_v36  ;;  %v153_v8 = vmul.f32 %v152_v23, %v142_v36 }
 0x109   :  { %s2465_s3 = sld [smem:[#allocation23_spill]]  ;;  %v2052_v40 = vmul.f32 %v874_v16, %v1790_v20  ;;  %v157_v50 = vmul.f32 %v156_v59, %v142_v36  ;;  %v348_v23 = vstv %s1996_s24 }
 0x10a   :  { %2464 = sst [smem:[#allocation21_spill]] %s2018_s29  ;;  %v162_v59 = vadd.f32 %v1910_v41, %v145_v62  ;;  %v166_v27 = vadd.f32 %v1913_v12, %v149_v18  ;;  %v170_v43 = vadd.f32 %v1919_v47, %v153_v8 }
 0x10b   :  { %s2466_s1 = sld [smem:[#allocation24_spill]]  ;;  %v278_v10 = vpop.permute.xlu2 %277 }
 0x10c   :  { %s2467_s22 = sld [smem:[#allocation25_spill]]  ;;  %v279_v49 = vsel %vm55_vm1, %v278_v10, 0.0  ;;  %v174_v10 = vadd.f32 %v1927_v35, %v157_v50 }
 0x10d   :  { %s2032_s28 = sld [smem:[#allocation4 + $0x12]] }
 0x10e   :  { %s2469_s23 = sld [smem:[#allocation13_spill]] }
 0x10f   :  { %s2470_s25 = sld [smem:[#allocation8_spill]]  ;;  %v281_v4 = vstv %s2465_s3 }
 0x110   :  { %s2471_s4 = sld [smem:[#allocation10_spill]]  ;;  %v2122_v41 = vmul.f32 %v281_v4, %v279_v49 }
 0x111   :  { %s2472_s16 = sld [smem:[#allocation15_spill]]  ;;  %v285_v28 = vstv %s2466_s1 }
 0x112   :  { %s2046_s6 = sld [smem:[#allocation4 + $0x2a]]  ;;  %v289_v26 = vstv %s2467_s22  ;;  %v286_v12 = vmul.f32 %v285_v28, %v279_v49 }
 0x113   :  { %2468 = sst [smem:[#allocation22_spill]] %s2032_s28  ;;  %v447_v19 = vpop.permute.xlu2 %446  ;;  %v290_v18 = vmul.f32 %v289_v26, %v279_v49 }
 0x114   :  { %s2474_s11 = sld [smem:[#allocation11_spill]]  ;;  %v293_v15 = vstv %s2469_s23  ;;  %v448_v8 = vsel %vm58_vm0, %v447_v19, 0.0 }
 0x115   :  { %s2475_s14 = sld [smem:[#allocation27_spill]]  ;;  %v450_v32 = vstv %s2470_s25  ;;  %v294_v47 = vmul.f32 %v293_v15, %v279_v49 }
 0x116   :  { %s2476_s28 = sld [smem:[#allocation28_spill]]  ;;  %v454_v1 = vstv %s2471_s4 }
 0x117   :  { %s2059_s29 = sld [smem:[#allocation4 + $0x42]]  ;;  %v458_v53 = vstv %s2472_s16 }
 0x118   :  { %2473 = sst [smem:[#allocation9_spill]] %s2046_s6 }
 0x119   :  { %s2067_s20 = sld [smem:[#allocation4 + $0x5a]] }
 0x11a   :  { %v462_v22 = vstv %s2474_s11  ;;  %s2073_s3 = sld [smem:[#allocation4 + $0xc]]  ;;  %v243_v42 = vpop.permute.xlu1 %242 }
 0x11b   :  { %v246_v6 = vstv %s2475_s14  ;;  %s2480_s22 = sld [smem:[#allocation17_spill]]  ;;  %v176_v62 = vpop.permute.xlu0 %175  ;;  %v244_v35 = vsel %vm58_vm0, %v243_v42, 0.0 }
 0x11c   :  { %v254_v7 = vstv %s2476_s28  ;;  %s2481_s23 = sld [smem:[#allocation18_spill]]  ;;  %v177_v4 = vsel %vm55_vm1, %v176_v62, 0.0  ;;  %v247_v15 = vmul.f32 %v246_v6, %v244_v35  ;;  %v251_v49 = vmul.f32 %v250_v13, %v244_v35 }
 0x11d   :  { %2477 = sst [smem:[#allocation14_spill]] %s2059_s29  ;;  %v180_v36 = vmul.f32 %v179_v30, %v177_v4  ;;  %v184_v28 = vmul.f32 %v183_v24, %v177_v4  ;;  %v188_v26 = vmul.f32 %v187_v31, %v177_v4  ;;  %v192_v42 = vmul.f32 %v191_v14, %v177_v4 }
 0x11e   :  { %s2079_s2 = sld [smem:[#allocation4 + $0x24]]  ;;  %v255_v19 = vmul.f32 %v254_v7, %v244_v35  ;;  %v259_v54 = vmul.f32 %v258_v34, %v244_v35 }
 0x11f   :  { %2478 = sst [smem:[#allocation12_spill]] %s2067_s20  ;;  %v181_v62 = vadd.f32 %v180_v36, %v162_v59  ;;  %v185_v9 = vadd.f32 %v184_v28, %v166_v27  ;;  %v189_v16 = vadd.f32 %v188_v26, %v170_v43  ;;  %v193_v30 = vadd.f32 %v192_v42, %v174_v10 }
 0x120   :  { %s2482_s7 = sld [smem:[#allocation19_spill]]  ;;  %v552_v50 = vstv %s2073_s3  ;;  %v451_v59 = vmul.f32 %v450_v32, %v448_v8  ;;  %v455_v36 = vmul.f32 %v454_v1, %v448_v8  ;;  %v459_v28 = vmul.f32 %v458_v53, %v448_v8  ;;  %v584_v53 = vpop.permute.xlu2 %583 }
 0x121   :  { %s2483_s11 = sld [smem:[#allocation20_spill]]  ;;  %v248_v13 = vadd.f32 %v247_v15, %v181_v62  ;;  %v252_v7 = vadd.f32 %v251_v49, %v185_v9  ;;  %v256_v34 = vadd.f32 %v255_v19, %v189_v16  ;;  %v260_v27 = vadd.f32 %v259_v54, %v193_v30 }
 0x122   :  { %s2086_s15 = sld [smem:[#allocation4 + $0x3c]]  ;;  %v380_v43 = vpop.permute.xlu1 %379  ;;  %v463_v9 = vmul.f32 %v462_v22, %v448_v8  ;;  %v2488_v62 = vstv %s2002_s13 }
 0x123   :  { %s2484_s18 = sld [smem:[#allocation21_spill]]  ;;  %v345_v10 = vpop.permute.xlu0 %344  ;;  %v264_v32 = vadd.f32 %v1932_v61, %v248_v13  ;;  %v268_v1 = vadd.f32 %v1939_v29, %v252_v7  ;;  %v272_v26 = vadd.f32 %v1947_v56, %v256_v34  ;;  %v276_v42 = vadd.f32 %v1950_v58, %v260_v27 }
 0x124   :  { %s2095_s12 = sld [smem:[#allocation4 + $0x54]]  ;;  %v381_v22 = vsel %vm55_vm1, %v380_v43, 0.0  ;;  %v346_v61 = vsel %vm58_vm0, %v345_v10, 0.0  ;;  %v2489_v13 = vstv %s2008_s26  ;;  %v585_v43 = vsel %vm55_vm1, %v584_v53, 0.0 }
 0x125   :  { %s2101_s5 = sld [smem:[#allocation4 + $0xb]]  ;;  %v283_v29 = vadd.f32 %v2122_v41, %v264_v32  ;;  %v287_v49 = vadd.f32 %v286_v12, %v268_v1  ;;  %v291_v56 = vadd.f32 %v290_v18, %v272_v26  ;;  %v295_v58 = vadd.f32 %v294_v47, %v276_v42 }
 0x126   :  { %s2108_s8 = sld [smem:[#allocation4 + $0x23]]  ;;  %v349_v19 = vmul.f32 %v348_v23, %v346_v61  ;;  %v353_v30 = vmul.f32 %v2488_v62, %v346_v61  ;;  %v357_v7 = vmul.f32 %v2489_v13, %v346_v61  ;;  %v2491_v26 = vstv %s2480_s22 }
 0x127   :  { %s2114_s27 = sld [smem:[#allocation4 + $0x3b]]  ;;  %v384_v42 = vmul.f32 %v2491_v26, %v381_v22  ;;  %v2492_v62 = vstv %s2481_s23  ;;  %v2494_v8 = vstv %s2483_s11 }
 0x128   :  { %s2120_s10 = sld [smem:[#allocation4 + $0x53]]  ;;  %v560_v24 = vstv %s2086_s15  ;;  %v350_v18 = vadd.f32 %v349_v19, %v283_v29  ;;  %v354_v47 = vadd.f32 %v353_v30, %v287_v49  ;;  %v358_v23 = vadd.f32 %v357_v7, %v291_v56 }
 0x129   :  { %s2127_s19 = sld [smem:[#allocation4 + $0x17]]  ;;  %v2490_v34 = vstv %s2484_s18  ;;  %v388_v13 = vmul.f32 %v2492_v62, %v381_v22  ;;  %v396_v53 = vmul.f32 %v2494_v8, %v381_v22 }
 0x12a   :  { %2485 = sst [smem:[#allocation16_spill]] %s2095_s12  ;;  %v564_v31 = vstv %s2095_s12  ;;  %v361_v27 = vmul.f32 %v2490_v34, %v346_v61  ;;  %v549_v1 = vpop.permute.xlu1 %548  ;;  %v2493_v61 = vstv %s2482_s7  ;;  %v366_v16 = vadd.f32 %v1953_v21, %v350_v18 }
 0x12b   :  { %s2131_s17 = sld [smem:[#allocation4 + $0x2f]]  ;;  %v485_v14 = vstv %s2101_s5  ;;  %v392_v34 = vmul.f32 %v2493_v61, %v381_v22  ;;  %v482_v54 = vpop.permute.xlu0 %481  ;;  %v370_v29 = vadd.f32 %v1959_v57, %v354_v47  ;;  %v374_v49 = vadd.f32 %v1962_v2, %v358_v23 }
 0x12c   :  { %s2139_s28 = sld [smem:[#allocation4 + $0x47]]  ;;  %v489_v6 = vstv %s2108_s8  ;;  %v362_v32 = vadd.f32 %v361_v27, %v295_v58  ;;  %v385_v22 = vadd.f32 %v384_v42, %v366_v16  ;;  %v2495_v57 = vstv %s1921_s21 }
 0x12d   :  { %s2141_s14 = sld [smem:[#allocation4 + $0x11]]  ;;  %v493_v35 = vstv %s2114_s27  ;;  %v389_v8 = vadd.f32 %v388_v13, %v370_v29  ;;  %v393_v27 = vadd.f32 %v392_v34, %v374_v49  ;;  %v588_v2 = vmul.f32 %v2495_v57, %v585_v43 }
 0x12e   :  { %s2143_s20 = sld [smem:[#allocation4 + $0x29]]  ;;  %v497_v4 = vstv %s2120_s10  ;;  %v378_v56 = vadd.f32 %v1970_v44, %v362_v32  ;;  %v2496_v18 = vstv %s1929_s9  ;;  %v550_v47 = vsel %vm58_vm0, %v549_v1, 0.0 }
 0x12f   :  { %s2145_s29 = sld [smem:[#allocation4 + $0x41]]  ;;  %v592_v44 = vmul.f32 %v2496_v18, %v585_v43  ;;  %v483_v23 = vsel %vm55_vm1, %v482_v54, 0.0  ;;  %v452_v16 = vadd.f32 %v451_v59, %v385_v22  ;;  %v456_v32 = vadd.f32 %v455_v36, %v389_v8 }
 0x130   :  { %s2151_s30 = sld [smem:[#allocation4 + $0x59]]  ;;  %v397_v21 = vadd.f32 %v396_v53, %v378_v56  ;;  %v460_v26 = vadd.f32 %v459_v28, %v393_v27  ;;  %v486_v62 = vmul.f32 %v485_v14, %v483_v23  ;;  %v490_v13 = vmul.f32 %v489_v6, %v483_v23 }
 0x131   :  { %s2153_s1 = sld [smem:[#allocation4 + $0xf]]  ;;  %v494_v61 = vmul.f32 %v493_v35, %v483_v23  ;;  %v498_v1 = vmul.f32 %v497_v4, %v483_v23  ;;  %v468_v54 = vadd.f32 %v1973_v45, %v452_v16  ;;  %v472_v34 = vadd.f32 %v1976_v60, %v456_v32  ;;  %v753_v60 = vpop.permute.xlu2 %752 }
 0x132   :  { %s2161_s0 = sld [smem:[#allocation4 + $0x27]]  ;;  %v464_v42 = vadd.f32 %v463_v9, %v397_v21  ;;  %v476_v59 = vadd.f32 %v1984_v25, %v460_v26  ;;  %v553_v14 = vmul.f32 %v552_v50, %v550_v47  ;;  %v2500_v6 = vstv %s2079_s2  ;;  %v686_v29 = vpop.permute.xlu1 %685 }
 0x133   :  { %s2169_s12 = sld [smem:[#allocation4 + $0x3f]]  ;;  %v689_v15 = vstv %s2141_s14  ;;  %v557_v35 = vmul.f32 %v2500_v6, %v550_v47  ;;  %v561_v4 = vmul.f32 %v560_v24, %v550_v47  ;;  %v565_v28 = vmul.f32 %v564_v31, %v550_v47  ;;  %v651_v45 = vpop.permute.xlu0 %650 }
 0x134   :  { %s2175_s25 = sld [smem:[#allocation4 + $0x57]]  ;;  %v693_v10 = vstv %s2143_s20  ;;  %v480_v36 = vadd.f32 %v1989_v37, %v464_v42  ;;  %v487_v25 = vadd.f32 %v486_v62, %v468_v54  ;;  %v491_v9 = vadd.f32 %v490_v13, %v472_v34 }
 0x135   :  { %v697_v41 = vstv %s2145_s29  ;;  %s2213_s7 = sld [smem:[#allocation4 + $0x15]]  ;;  %v495_v37 = vadd.f32 %v494_v61, %v476_v59  ;;  %v652_v24 = vsel %vm58_vm0, %v651_v45, 0.0  ;;  %v754_v18 = vsel %vm58_vm0, %v753_v60, 0.0 }
 0x136   :  { %v701_v12 = vstv %s2151_s30  ;;  %s2215_s24 = sld [smem:[#allocation4 + $0x2d]]  ;;  %v499_v53 = vadd.f32 %v498_v1, %v480_v36  ;;  %v554_v31 = vadd.f32 %v553_v14, %v487_v25  ;;  %v558_v27 = vadd.f32 %v557_v35, %v491_v9 }
 0x137   :  { %v654_v58 = vstv %s2153_s1  ;;  %s2235_s21 = sld [smem:[#allocation4 + $0x2c]]  ;;  %v562_v21 = vadd.f32 %v561_v4, %v495_v37  ;;  %v687_v47 = vsel %vm55_vm1, %v686_v29, 0.0 }
 0x138   :  { %v658_v19 = vstv %s2161_s0  ;;  %s2225_s0 = sld [smem:[#allocation4 + $0x14]]  ;;  %v566_v57 = vadd.f32 %v565_v28, %v499_v53  ;;  %v574_v32 = vadd.f32 %v2011_v46, %v558_v27  ;;  %v655_v62 = vmul.f32 %v654_v58, %v652_v24 }
 0x139   :  { %v662_v30 = vstv %s2169_s12  ;;  %s2498_s9 = sld [smem:[#allocation31_spill]]  ;;  %v578_v26 = vadd.f32 %v2014_v52, %v562_v21  ;;  %v659_v13 = vmul.f32 %v658_v19, %v652_v24  ;;  %v690_v35 = vmul.f32 %v689_v15, %v687_v47  ;;  %v890_v28 = vpop.permute.xlu2 %889 }
 0x13a   :  { %v666_v7 = vstv %s2175_s25  ;;  %s2499_s13 = sld [smem:[#allocation32_spill]]  ;;  %v582_v42 = vadd.f32 %v2021_v51, %v566_v57  ;;  %v663_v61 = vmul.f32 %v662_v30, %v652_v24  ;;  %v593_v54 = vadd.f32 %v592_v44, %v574_v32  ;;  %v855_v37 = vpop.permute.xlu1 %854 }
 0x13b   :  { %s2241_s4 = sld [smem:[#allocation4 + $0x44]]  ;;  %v858_v8 = vstv %s2213_s7  ;;  %v667_v1 = vmul.f32 %v666_v7, %v652_v24  ;;  %v788_v6 = vpop.permute.xlu0 %787  ;;  %v698_v44 = vmul.f32 %v697_v41, %v687_v47  ;;  %v702_v4 = vmul.f32 %v701_v12, %v687_v47 }
 0x13c   :  { %s2251_s16 = sld [smem:[#allocation4 + $0x5c]]  ;;  %v862_v23 = vstv %s2215_s24  ;;  %v660_v19 = vadd.f32 %v659_v13, %v593_v54  ;;  %v789_v12 = vsel %vm55_vm1, %v788_v6, 0.0  ;;  %v856_v24 = vsel %vm58_vm0, %v855_v37, 0.0 }
 0x13d   :  { %s2503_s2 = sld [smem:[#allocation22_spill]]  ;;  %v795_v36 = vstv %s2235_s21  ;;  %v863_v13 = vmul.f32 %v862_v23, %v856_v24 }
 0x13e   :  { %v791_v16 = vstv %s2225_s0  ;;  %s2270_s6 = sld [smem:[#allocation4 + $0x45]]  ;;  %v676_v60 = vadd.f32 %v2027_v0, %v660_v19  ;;  %v2518_v19 = vstv %s2131_s17 }
 0x13f   :  { %v2501_v49 = vstv %s2498_s9  ;;  %s2272_s11 = sld [smem:[#allocation4 + $0x5d]] }
 0x140   :  { %v596_v56 = vmul.f32 %v2501_v49, %v585_v43  ;;  %v2502_v50 = vstv %s2499_s13  ;;  %s2505_s3 = sld [smem:[#allocation9_spill]] }
 0x141   :  { %v600_v22 = vmul.f32 %v2502_v50, %v585_v43  ;;  %v570_v43 = vadd.f32 %v1992_v63, %v554_v31  ;;  %v799_v51 = vstv %s2241_s4  ;;  %s2506_s1 = sld [smem:[#allocation14_spill]] }
 0x142   :  { %v597_v46 = vadd.f32 %v596_v56, %v578_v26  ;;  %v803_v14 = vstv %s2251_s16  ;;  %s2507_s22 = sld [smem:[#allocation12_spill]] }
 0x143   :  { %v589_v63 = vadd.f32 %v588_v2, %v570_v43  ;;  %v601_v34 = vadd.f32 %v600_v22, %v582_v42  ;;  %v2504_v59 = vstv %s2503_s2  ;;  %v694_v2 = vmul.f32 %v693_v10, %v687_v47  ;;  %s2297_s20 = sld [smem:[#allocation4 + $0x5f]] }
 0x144   :  { %v757_v52 = vmul.f32 %v2504_v59, %v754_v18  ;;  %v664_v30 = vadd.f32 %v663_v61, %v597_v46  ;;  %v796_v47 = vmul.f32 %v795_v36, %v789_v12  ;;  %s2511_s29 = sld [smem:[#allocation26_spill]]  ;;  %v800_v43 = vmul.f32 %v799_v51, %v789_v12 }
 0x145   :  { %v656_v58 = vadd.f32 %v655_v62, %v589_v63  ;;  %v668_v7 = vadd.f32 %v667_v1, %v601_v34  ;;  %v695_v56 = vadd.f32 %v694_v2, %v676_v60  ;;  %v870_v22 = vstv %s2272_s11  ;;  %s2512_s23 = sld [smem:[#allocation29_spill]] }
 0x146   :  { %v680_v25 = vadd.f32 %v2030_v39, %v664_v30  ;;  %v2508_v53 = vstv %s2505_s3  ;;  %v891_v39 = vsel %vm55_vm1, %v890_v28, 0.0  ;;  %v804_v32 = vmul.f32 %v803_v14, %v789_v12  ;;  %s2513_s15 = sld [smem:[#allocation30_spill]] }
 0x147   :  { %v672_v45 = vadd.f32 %v2024_v33, %v656_v58  ;;  %v684_v9 = vadd.f32 %v2035_v48, %v668_v7  ;;  %v761_v15 = vmul.f32 %v2508_v53, %v754_v18  ;;  %v2509_v29 = vstv %s2506_s1  ;;  %s2520_s5 = sld [smem:[#allocation33_spill]] }
 0x148   :  { %v765_v10 = vmul.f32 %v2509_v29, %v754_v18  ;;  %v2510_v49 = vstv %s2507_s22  ;;  %v699_v50 = vadd.f32 %v698_v44, %v680_v25  ;;  %v866_v48 = vstv %s2270_s6 }
 0x149   :  { %v769_v41 = vmul.f32 %v2510_v49, %v754_v18  ;;  %v691_v33 = vadd.f32 %v690_v35, %v672_v45  ;;  %v703_v0 = vadd.f32 %v702_v4, %v684_v9  ;;  %v762_v27 = vadd.f32 %v761_v15, %v695_v56 }
 0x14a   :  { %v766_v21 = vadd.f32 %v765_v10, %v699_v50  ;;  %v792_v18 = vmul.f32 %v791_v16, %v789_v12  ;;  %v859_v62 = vmul.f32 %v858_v8, %v856_v24  ;;  %v867_v16 = vmul.f32 %v866_v48, %v856_v24 }
 0x14b   :  { %v758_v31 = vadd.f32 %v757_v52, %v691_v33  ;;  %v770_v57 = vadd.f32 %v769_v41, %v703_v0  ;;  %v778_v26 = vadd.f32 %v2041_v3, %v762_v27  ;;  %v871_v61 = vmul.f32 %v870_v22, %v856_v24 }
 0x14c   :  { %v782_v42 = vadd.f32 %v2044_v17, %v766_v21  ;;  %v905_v34 = vstv %s2297_s20  ;;  %v2515_v17 = vstv %s2512_s23  ;;  %v2517_v14 = vstv %s2127_s19 }
 0x14d   :  { %v774_v38 = vadd.f32 %v2038_v5, %v758_v31  ;;  %v786_v11 = vadd.f32 %v2049_v55, %v770_v57  ;;  %v797_v63 = vadd.f32 %v796_v47, %v778_v26  ;;  %v2514_v5 = vstv %s2511_s29 }
 0x14e   :  { %v801_v54 = vadd.f32 %v800_v43, %v782_v42  ;;  %v879_v3 = vmul.f32 %v2514_v5, %v1790_v20  ;;  %v883_v59 = vmul.f32 %v2515_v17, %v1790_v20  ;;  %v2516_v55 = vstv %s2513_s15 }
 0x14f   :  { %v793_v1 = vadd.f32 %v792_v18, %v774_v38  ;;  %v805_v46 = vadd.f32 %v804_v32, %v786_v11  ;;  %v887_v8 = vmul.f32 %v2516_v55, %v1790_v20  ;;  %v864_v23 = vadd.f32 %v863_v13, %v797_v63 }
 0x150   :  { %v868_v36 = vadd.f32 %v867_v16, %v801_v54  ;;  %v894_v58 = vmul.f32 %v2517_v14, %v891_v39  ;;  %v898_v30 = vmul.f32 %v2518_v19, %v891_v39  ;;  %v2519_v7 = vstv %s2139_s28 }
 0x151   :  { %v860_v52 = vadd.f32 %v859_v62, %v793_v1  ;;  %v872_v51 = vadd.f32 %v871_v61, %v805_v46  ;;  %v902_v6 = vmul.f32 %v2519_v7, %v891_v39  ;;  %v880_v2 = vadd.f32 %v879_v3, %v864_v23 }
 0x152   :  { %v884_v44 = vadd.f32 %v883_v59, %v868_v36  ;;  %v906_v28 = vmul.f32 %v905_v34, %v891_v39 }
 0x153   :  { %v876_v35 = vadd.f32 %v2052_v40, %v860_v52  ;;  %v888_v4 = vadd.f32 %v887_v8, %v872_v51  ;;  %v899_v60 = vadd.f32 %v898_v30, %v880_v2 }
 0x154   :  { %v903_v25 = vadd.f32 %v902_v6, %v884_v44 }
 0x155   :  { %v895_v45 = vadd.f32 %v894_v58, %v876_v35  ;;  %v907_v20 = vadd.f32 %v906_v28, %v888_v4  ;;  %1114 = vst [vmem:[%s2520_s5 + $0x1] sm:$0x1] %v899_v60 }
 0x156   :  { %1115 = vst [vmem:[%s2520_s5 + $0x2] sm:$0x1] %v903_v25 }
 0x157   :  { %908 = vst [vmem:[%s2520_s5] sm:$0x1] %v895_v45 }
 0x158   :  { %1116 = vst [vmem:[%s2520_s5 + $0x3] sm:$0x1] %v907_v20 }
 0x159   :  { %919 = vsyncpa [#allocation3], 1 }
 0x15a   :  { %920 = vsyncpa [#allocation5], 1 }

</bundles_post_ra>
